<compile_context>
chip_gen: v7x
topology: tpu7x:2x2x1
jax: 0.10.0
libtpu: 0.0.40
codegen_flags: <defaults>
</compile_context>

<pallas_src>
import functools

import jax
import jax.numpy as jnp
from jax import lax
from jax.experimental import pallas as pl
from jax.experimental.pallas import tpu as pltpu


def _round_up(a, b):
    return -(-a // b) * b


def _fp_fused_kernel(x_ref, posT_ref, batch_row_ref, pos_skip_ref, batch_skip_ref,
                     x_skip_ref, w1a_ref, w1b_ref, b1_ref, w2_ref, b2_ref,
                     out_ref, topk_ref, num_ref, den_ref, *, k, fuse_den):
    p = pl.program_id(1)                 # 0: top-k scan pass, 1: accumulate pass
    ni = pl.program_id(2)
    n_last = pl.num_programs(2) - 1

    mt = pos_skip_ref.shape[0]
    nt = posT_ref.shape[1]
    INF = jnp.float32(jnp.inf)

    # ---- squared distances on the VPU: per-coordinate diff-square-accumulate ----
    ps = pos_skip_ref[...]               # [Mt, 3]
    pt = posT_ref[...]                   # [3, Nt]
    d2 = jnp.zeros((mt, nt), jnp.float32)
    for c in range(3):
        diff = ps[:, c:c + 1] - pt[c:c + 1, :]          # [Mt, Nt]
        d2 = d2 + diff * diff

    # TODO(synk): bucket points by graph in the wrapper + scalar-prefetch offsets
    # so fully cross-batch [Mt,Nt] tiles are skipped instead of masked.
    same_batch = batch_skip_ref[...] == batch_row_ref[...]   # [Mt, Nt]
    d = jnp.where(same_batch, d2, INF)

    @pl.when(jnp.logical_and(p == 0, ni == 0))
    def _init():
        topk_ref[...] = jnp.full(topk_ref.shape, INF, topk_ref.dtype)
        num_ref[...] = jnp.zeros(num_ref.shape, num_ref.dtype)
        den_ref[...] = jnp.zeros(den_ref.shape, den_ref.dtype)

    # ------- pass 0: maintain running top-k distances per skip row -------
    @pl.when(p == 0)
    def _scan():
        # k smallest within this N tile (exact; first-occurrence tie handling).
        cand = d
        col = lax.broadcasted_iota(jnp.int32, (mt, nt), 1)
        for j in range(k):
            dmin = jnp.min(cand, axis=1, keepdims=True)
            first = jnp.min(jnp.where(cand == dmin, col, nt), axis=1, keepdims=True)
            cand = jnp.where(col == first, INF, cand)
            topk_ref[:, k + j:k + j + 1] = dmin          # stage tile minima
        # Merge staged tile minima with the running top-k (width 2k -> cheap).
        merged = topk_ref[...]                           # [Mt, 2k] (in registers)
        mcol = lax.broadcasted_iota(jnp.int32, (mt, 2 * k), 1)
        for j in range(k):
            dmin = jnp.min(merged, axis=1, keepdims=True)
            first = jnp.min(jnp.where(merged == dmin, mcol, 2 * k),
                            axis=1, keepdims=True)
            merged = jnp.where(mcol == first, INF, merged)
            topk_ref[:, j:j + 1] = dmin

    # ------- pass 1: accumulate inverse-distance weights and w·x -------
    @pl.when(p == 1)
    def _accum():
        thr = jnp.max(topk_ref[:, :k], axis=1, keepdims=True)   # kth smallest d²
        sel = jnp.logical_and(same_batch, d <= thr)
        w = jnp.where(sel,
                      pl.reciprocal(jnp.maximum(d2, 1e-16), approx=True),  # EUP
                      0.0)
        # If fuse_den, x has an extra all-ones column so Σw comes out of the MXU
        # matmul for free (no full-width cross-lane reduction needed).
        num_ref[...] += jnp.dot(w, x_ref[...], preferred_element_type=jnp.float32)
        if not fuse_den:
            den_ref[...] += jnp.sum(w, axis=1, keepdims=True)

    # ------- finalize: interpolation + fused MLP, one lane-dense store -------
    @pl.when(jnp.logical_and(p == 1, ni == n_last))
    def _final():
        num = num_ref[...]
        if fuse_den:
            c_aug = num.shape[1]
            den = num[:, c_aug - 1:c_aug]                # Σw lives in last column
        else:
            den = den_ref[...]
        xi = num / jnp.maximum(den, 1e-30)               # guard empty rows
        # (When fuse_den, xi's extra column hits a zero row of W1a -> no effect.)
        h = (jnp.dot(xi, w1a_ref[...], preferred_element_type=jnp.float32)
             + jnp.dot(x_skip_ref[...], w1b_ref[...], preferred_element_type=jnp.float32)
             + b1_ref[...])
        h = jnp.maximum(h, 0.0)
        out_ref[...] = (jnp.dot(h, w2_ref[...], preferred_element_type=jnp.float32)
                        + b2_ref[...]).astype(out_ref.dtype)


def fp_module_forward(x, pos, batch, x_skip, pos_skip, batch_skip, params, *, k,
                      m_tile=256, n_tile=2048):
    N, c_in = x.shape
    M, c_skip = x_skip.shape
    w1a, w1b, b1, w2, b2 = params
    hid = w1a.shape[1]
    c_out = w2.shape[1]
    f32 = jnp.float32

    # Fuse the Σw denominator into the interpolation matmul only when the extra
    # feature column is free (rides in MXU lane padding); if C_in is already a
    # multiple of 128, an extra column would add a whole 128-lane MXU chunk.
    fuse_den = (c_in % 128) != 0
    c_x = c_in + 1 if fuse_den else c_in

    # Tile sizing: Mt multiple of 8 (sublane), Nt multiple of 128 (lane);
    # defaults keep the per-tile working set v7x-safe (< ~24 MiB of temps).
    m_tile = min(m_tile, _round_up(M, 8))
    n_tile = min(n_tile, _round_up(N, 128))
    M_pad = _round_up(M, m_tile)
    N_pad = _round_up(N, n_tile)
    hid_pad = _round_up(hid, 128)
    c_out_pad = _round_up(c_out, 128)

    # Padding: padded source columns get batch=-1, padded skip rows batch=-2,
    # so the same-batch mask excludes them (real batch ids are >= 0).
    xp = jnp.zeros((N_pad, c_x), f32).at[:N, :c_in].set(x.astype(f32))
    if fuse_den:
        xp = xp.at[:N, c_in].set(1.0)                    # ones column -> Σw via MXU
    pos_T = jnp.zeros((3, N_pad), f32).at[:, :N].set(pos.astype(f32).T)
    batch_row = jnp.full((1, N_pad), -1, jnp.int32).at[0, :N].set(batch.astype(jnp.int32))
    xs = jnp.zeros((M_pad, c_skip), f32).at[:M, :].set(x_skip.astype(f32))
    pos_s = jnp.zeros((M_pad, 3), f32).at[:M, :].set(pos_skip.astype(f32))
    batch_s = jnp.full((M_pad, 1), -2, jnp.int32).at[:M, 0].set(batch_skip.astype(jnp.int32))

    # MLP weights zero-padded to lane-dense widths (result sliced back below).
    # Row c_in of W1a (the ones-column row, if present) stays zero.
    w1a_p = jnp.zeros((c_x, hid_pad), f32).at[:c_in, :hid].set(w1a.astype(f32))
    w1b_p = jnp.zeros((c_skip, hid_pad), f32).at[:, :hid].set(w1b.astype(f32))
    b1_p = jnp.zeros((1, hid_pad), f32).at[:, :hid].set(b1.reshape(1, hid).astype(f32))
    w2_p = jnp.zeros((hid_pad, c_out_pad), f32).at[:hid, :c_out].set(w2.astype(f32))
    b2_p = jnp.zeros((1, c_out_pad), f32).at[:, :c_out].set(b2.reshape(1, c_out).astype(f32))

    grid = (M_pad // m_tile, 2, N_pad // n_tile)

    out = pl.pallas_call(
        functools.partial(_fp_fused_kernel, k=k, fuse_den=fuse_den),
        out_shape=jax.ShapeDtypeStruct((M_pad, c_out_pad), f32),
        grid_spec=pltpu.PrefetchScalarGridSpec(
            num_scalar_prefetch=0,
            grid=grid,
            in_specs=[
                # x is only needed in pass 1: during pass 0 pin block 0 (no re-DMA).
                pl.BlockSpec((n_tile, c_x), lambda mi, p, ni: (ni * p, 0)),     # x (+ones)
                pl.BlockSpec((3, n_tile), lambda mi, p, ni: (0, ni)),           # pos^T
                pl.BlockSpec((1, n_tile), lambda mi, p, ni: (0, ni)),           # batch row
                pl.BlockSpec((m_tile, 3), lambda mi, p, ni: (mi, 0)),           # pos_skip
                pl.BlockSpec((m_tile, 1), lambda mi, p, ni: (mi, 0)),           # batch_skip col
                pl.BlockSpec((m_tile, c_skip), lambda mi, p, ni: (mi, 0)),      # x_skip
                pl.BlockSpec((c_x, hid_pad), lambda mi, p, ni: (0, 0)),         # W1a (resident)
                pl.BlockSpec((c_skip, hid_pad), lambda mi, p, ni: (0, 0)),      # W1b
                pl.BlockSpec((1, hid_pad), lambda mi, p, ni: (0, 0)),           # b1
                pl.BlockSpec((hid_pad, c_out_pad), lambda mi, p, ni: (0, 0)),   # W2
                pl.BlockSpec((1, c_out_pad), lambda mi, p, ni: (0, 0)),         # b2
            ],
            out_specs=pl.BlockSpec((m_tile, c_out_pad), lambda mi, p, ni: (mi, 0)),
            scratch_shapes=[
                pltpu.VMEM((m_tile, 2 * k), jnp.float32),   # running top-k (+ staging)
                pltpu.VMEM((m_tile, c_x), jnp.float32),     # Σ w·x  (+ Σw column if fused)
                pltpu.VMEM((m_tile, 1), jnp.float32),       # Σ w    (only if not fused)
            ]),
        compiler_params=pltpu.CompilerParams(
            dimension_semantics=("parallel", "arbitrary", "arbitrary"),
            vmem_limit_bytes=48 * 1024 * 1024),
    )(xp, pos_T, batch_row, pos_s, batch_s, xs, w1a_p, w1b_p, b1_p, w2_p, b2_p)

    return out[:M, :c_out], pos_skip, batch_skip


def _reference(x, pos, batch, x_skip, pos_skip, batch_skip, params, *, k):
    """Pure-JAX re-implementation of the PyG forward, for validation."""
    d2 = jnp.sum((pos_skip[:, None, :] - pos[None, :, :]) ** 2, axis=-1)
    d2 = jnp.where(batch_skip[:, None] == batch[None, :], d2, jnp.inf)
    neg_top, idx = lax.top_k(-d2, k)
    dk = -neg_top
    w = 1.0 / jnp.maximum(dk, 1e-16)
    xi = jnp.einsum('mk,mkc->mc', w, x[idx]) / jnp.sum(w, axis=1, keepdims=True)
    h = jnp.concatenate([xi, x_skip], axis=1)
    w1 = jnp.concatenate([params[0], params[1]], axis=0)
    h = jnp.maximum(h @ w1 + params[2], 0.0)
    return h @ params[3] + params[4]


def _make_params(key, c_in, c_skip, hid, c_out):
    """Deterministic params for self.nn = Linear(c_in+c_skip, hid)->ReLU->Linear(hid, c_out)."""
    k5, k6, k7, k8, k9 = jax.random.split(key, 5)
    s1 = 1.0 / jnp.sqrt(jnp.float32(c_in + c_skip))
    s2 = 1.0 / jnp.sqrt(jnp.float32(hid))
    return (
        jax.random.uniform(k5, (c_in, hid), jnp.float32, -s1, s1),     # W1a
        jax.random.uniform(k6, (c_skip, hid), jnp.float32, -s1, s1),   # W1b
        jax.random.uniform(k7, (1, hid), jnp.float32, -s1, s1),        # b1
        jax.random.uniform(k8, (hid, c_out), jnp.float32, -s2, s2),    # W2
        jax.random.uniform(k9, (1, c_out), jnp.float32, -s2, s2),      # b2
    )


def _run_case(key, *, k, n, m, c_in, c_skip, hid, c_out):
    k1, k2, k3, k4, kp = jax.random.split(key, 5)
    x = jax.random.normal(k1, (n, c_in), jnp.float32)
    pos = jax.random.normal(k2, (n, 3), jnp.float32)
    x_skip = jax.random.normal(k3, (m, c_skip), jnp.float32)
    pos_skip = jax.random.normal(k4, (m, 3), jnp.float32)
    batch = jnp.concatenate([jnp.zeros(n // 2, jnp.int32), jnp.ones(n - n // 2, jnp.int32)])
    batch_skip = jnp.concatenate([jnp.zeros(m // 2, jnp.int32), jnp.ones(m - m // 2, jnp.int32)])
    params = _make_params(kp, c_in, c_skip, hid, c_out)

    out, out_pos, out_batch = fp_module_forward(
        x, pos, batch, x_skip, pos_skip, batch_skip, params, k=k)
    jax.block_until_ready(out)

    ref = _reference(x, pos, batch, x_skip, pos_skip, batch_skip, params, k=k)
    assert out.shape == (m, c_out)
    # Tolerance accounts for the EUP approximate reciprocal used for the 1/d² weights.
    assert jnp.allclose(out, ref, rtol=1e-2, atol=1e-2), (
        "mismatch vs reference, max |diff| = %s" % jnp.max(jnp.abs(out - ref)))
    assert out_pos.shape == pos_skip.shape and out_batch.shape == batch_skip.shape


if __name__ == "__main__":
    key = jax.random.PRNGKey(0)
    key_a, key_b = jax.random.split(key, 2)

    # Case 1: small channels -> Σw fused into the MXU matmul (ones column path).
    _run_case(key_a, k=3, n=16, m=32, c_in=4, c_skip=8, hid=32, c_out=16)

    # Case 2: lane-aligned C_in (multiple of 128) -> explicit Σw reduction path.
    _run_case(key_b, k=2, n=16, m=24, c_in=128, c_skip=16, hid=64, c_out=32)

    print("KERNEL_OK")
</pallas_src>

<mosaic_0001>
module attributes {stable_mosaic.version = 11 : i64} {
  func.func @_fp_fused_kernel(%arg0: i32, %arg1: i32, %arg2: i32, %arg3: memref<128x5xf32, #tpu.memory_space<vmem>>, %arg4: memref<3x128xf32, #tpu.memory_space<vmem>>, %arg5: memref<1x128xi32, #tpu.memory_space<vmem>>, %arg6: memref<32x3xf32, #tpu.memory_space<vmem>>, %arg7: memref<32x1xi32, #tpu.memory_space<vmem>>, %arg8: memref<32x8xf32, #tpu.memory_space<vmem>>, %arg9: memref<5x128xf32, #tpu.memory_space<vmem>>, %arg10: memref<8x128xf32, #tpu.memory_space<vmem>>, %arg11: memref<1x128xf32, #tpu.memory_space<vmem>>, %arg12: memref<128x128xf32, #tpu.memory_space<vmem>>, %arg13: memref<1x128xf32, #tpu.memory_space<vmem>>, %arg14: memref<32x128xf32, #tpu.memory_space<vmem>>, %arg15: memref<32x6xf32, #tpu.memory_space<vmem>>, %arg16: memref<32x5xf32, #tpu.memory_space<vmem>>, %arg17: memref<32x1xf32, #tpu.memory_space<vmem>>) attributes {dimension_semantics = [#tpu.dimension_semantics<parallel>, #tpu.dimension_semantics<arbitrary>, #tpu.dimension_semantics<arbitrary>], iteration_bounds = array<i64: 1, 2, 1>, scalar_prefetch = 0 : i64, scratch_operands = 3 : i64, tpu.core_type = #tpu.core_type<tc>, window_params = [{transform_indices = @transform_0, window_bounds = array<i64: 128, 5>}, {transform_indices = @transform_1, window_bounds = array<i64: 3, 128>}, {transform_indices = @transform_2, window_bounds = array<i64: 1, 128>}, {transform_indices = @transform_3, window_bounds = array<i64: 32, 3>}, {transform_indices = @transform_4, window_bounds = array<i64: 32, 1>}, {transform_indices = @transform_5, window_bounds = array<i64: 32, 8>}, {pipeline_mode = #tpu.pipeline_mode<synchronous>, transform_indices = @transform_6, window_bounds = array<i64: 5, 128>}, {pipeline_mode = #tpu.pipeline_mode<synchronous>, transform_indices = @transform_7, window_bounds = array<i64: 8, 128>}, {pipeline_mode = #tpu.pipeline_mode<synchronous>, transform_indices = @transform_8, window_bounds = array<i64: 1, 128>}, {pipeline_mode = #tpu.pipeline_mode<synchronous>, transform_indices = @transform_9, window_bounds = array<i64: 128, 128>}, {pipeline_mode = #tpu.pipeline_mode<synchronous>, transform_indices = @transform_10, window_bounds = array<i64: 1, 128>}, {transform_indices = @transform_11, window_bounds = array<i64: 32, 128>}]} {
    %c0 = arith.constant 0 : index
    %c0_0 = arith.constant 0 : index
    %0 = vector.load %arg6[%c0, %c0_0] : memref<32x3xf32, #tpu.memory_space<vmem>>, vector<32x3xf32>
    %c0_1 = arith.constant 0 : index
    %c0_2 = arith.constant 0 : index
    %1 = vector.load %arg4[%c0_1, %c0_2] : memref<3x128xf32, #tpu.memory_space<vmem>>, vector<3x128xf32>
    %cst = arith.constant 0.000000e+00 : f32
    %2 = vector.broadcast %cst : f32 to vector<32x128xf32>
    %3 = vector.extract_strided_slice %0 {offsets = [0, 0], sizes = [32, 1], strides = [1, 1]} : vector<32x3xf32> to vector<32x1xf32>
    %4 = vector.extract_strided_slice %1 {offsets = [0, 0], sizes = [1, 128], strides = [1, 1]} : vector<3x128xf32> to vector<1x128xf32>
    %5 = vector.broadcast %3 : vector<32x1xf32> to vector<32x128xf32>
    %6 = vector.broadcast %4 : vector<1x128xf32> to vector<32x128xf32>
    %7 = arith.subf %5, %6 : vector<32x128xf32>
    %8 = arith.mulf %7, %7 : vector<32x128xf32>
    %9 = arith.addf %2, %8 : vector<32x128xf32>
    %10 = vector.extract_strided_slice %0 {offsets = [0, 1], sizes = [32, 1], strides = [1, 1]} : vector<32x3xf32> to vector<32x1xf32>
    %11 = vector.extract_strided_slice %1 {offsets = [1, 0], sizes = [1, 128], strides = [1, 1]} : vector<3x128xf32> to vector<1x128xf32>
    %12 = vector.broadcast %10 : vector<32x1xf32> to vector<32x128xf32>
    %13 = vector.broadcast %11 : vector<1x128xf32> to vector<32x128xf32>
    %14 = arith.subf %12, %13 : vector<32x128xf32>
    %15 = arith.mulf %14, %14 : vector<32x128xf32>
    %16 = arith.addf %9, %15 : vector<32x128xf32>
    %17 = vector.extract_strided_slice %0 {offsets = [0, 2], sizes = [32, 1], strides = [1, 1]} : vector<32x3xf32> to vector<32x1xf32>
    %18 = vector.extract_strided_slice %1 {offsets = [2, 0], sizes = [1, 128], strides = [1, 1]} : vector<3x128xf32> to vector<1x128xf32>
    %19 = vector.broadcast %17 : vector<32x1xf32> to vector<32x128xf32>
    %20 = vector.broadcast %18 : vector<1x128xf32> to vector<32x128xf32>
    %21 = arith.subf %19, %20 : vector<32x128xf32>
    %22 = arith.mulf %21, %21 : vector<32x128xf32>
    %23 = arith.addf %16, %22 : vector<32x128xf32>
    %c0_3 = arith.constant 0 : index
    %c0_4 = arith.constant 0 : index
    %24 = vector.load %arg7[%c0_3, %c0_4] : memref<32x1xi32, #tpu.memory_space<vmem>>, vector<32x1xi32>
    %c0_5 = arith.constant 0 : index
    %c0_6 = arith.constant 0 : index
    %25 = vector.load %arg5[%c0_5, %c0_6] : memref<1x128xi32, #tpu.memory_space<vmem>>, vector<1x128xi32>
    %26 = vector.broadcast %24 : vector<32x1xi32> to vector<32x128xi32>
    %27 = vector.broadcast %25 : vector<1x128xi32> to vector<32x128xi32>
    %28 = arith.cmpi eq, %26, %27 : vector<32x128xi32>
    %cst_7 = arith.constant 0x7F800000 : f32
    %29 = vector.broadcast %cst_7 : f32 to vector<32x128xf32>
    %30 = arith.select %28, %23, %29 : vector<32x128xi1>, vector<32x128xf32>
    %c0_i32 = arith.constant 0 : i32
    %31 = arith.cmpi eq, %arg1, %c0_i32 : i32
    %c0_i32_8 = arith.constant 0 : i32
    %32 = arith.cmpi eq, %arg2, %c0_i32_8 : i32
    %33 = arith.andi %31, %32 : i1
    %34 = arith.extui %33 : i1 to i32
    %cst_9 = arith.constant 0x7F800000 : f32
    %c0_i32_10 = arith.constant 0 : i32
    %35 = arith.cmpi ne, %34, %c0_i32_10 : i32
    scf.if %35 {
      %47 = vector.broadcast %cst_9 : f32 to vector<32x6xf32>
      %c0_18 = arith.constant 0 : index
      %c0_19 = arith.constant 0 : index
      %48 = vector.load %arg15[%c0_18, %c0_19] : memref<32x6xf32, #tpu.memory_space<vmem>>, vector<32x6xf32>
      tpu.vector_store %arg15[%c0_18, %c0_19], %47 {strides = array<i32>} : memref<32x6xf32, #tpu.memory_space<vmem>>, vector<32x6xf32>,
      %cst_20 = arith.constant 0.000000e+00 : f32
      %49 = vector.broadcast %cst_20 : f32 to vector<32x5xf32>
      %c0_21 = arith.constant 0 : index
      %c0_22 = arith.constant 0 : index
      %50 = vector.load %arg16[%c0_21, %c0_22] : memref<32x5xf32, #tpu.memory_space<vmem>>, vector<32x5xf32>
      tpu.vector_store %arg16[%c0_21, %c0_22], %49 {strides = array<i32>} : memref<32x5xf32, #tpu.memory_space<vmem>>, vector<32x5xf32>,
      %cst_23 = arith.constant 0.000000e+00 : f32
      %51 = vector.broadcast %cst_23 : f32 to vector<32x1xf32>
      %c0_24 = arith.constant 0 : index
      %c0_25 = arith.constant 0 : index
      %52 = vector.load %arg17[%c0_24, %c0_25] : memref<32x1xf32, #tpu.memory_space<vmem>>, vector<32x1xf32>
      tpu.vector_store %arg17[%c0_24, %c0_25], %51 {strides = array<i32>} : memref<32x1xf32, #tpu.memory_space<vmem>>, vector<32x1xf32>,
    } else {
    }
    %c0_i32_11 = arith.constant 0 : i32
    %36 = arith.cmpi eq, %arg1, %c0_i32_11 : i32
    %37 = arith.extui %36 : i1 to i32
    %cst_12 = arith.constant 0x7F800000 : f32
    %c0_i32_13 = arith.constant 0 : i32
    %38 = arith.cmpi ne, %37, %c0_i32_13 : i32
    scf.if %38 {
      %47 = tpu.iota {dimensions = array<i32: 1>} : vector<32x128xi32>
      %cst_18 = arith.constant dense<0x7F800000> : vector<32xf32>
      %48 = vector.multi_reduction <minimumf>, %30, %cst_18 [1] : vector<32x128xf32> to vector<32xf32>
      %49 = vector.shape_cast %48 : vector<32xf32> to vector<32x1xf32>
      %50 = vector.broadcast %49 : vector<32x1xf32> to vector<32x128xf32>
      %51 = arith.cmpf oeq, %30, %50 : vector<32x128xf32>
      %c128_i32 = arith.constant 128 : i32
      %52 = vector.broadcast %c128_i32 : i32 to vector<32x128xi32>
      %53 = arith.select %51, %47, %52 : vector<32x128xi1>, vector<32x128xi32>
      %cst_19 = arith.constant dense<2147483647> : vector<32xi32>
      %54 = vector.multi_reduction <minsi>, %53, %cst_19 [1] : vector<32x128xi32> to vector<32xi32>
      %55 = vector.shape_cast %54 : vector<32xi32> to vector<32x1xi32>
      %56 = vector.broadcast %55 : vector<32x1xi32> to vector<32x128xi32>
      %57 = arith.cmpi eq, %47, %56 : vector<32x128xi32>
      %58 = vector.broadcast %cst_12 : f32 to vector<32x128xf32>
      %59 = arith.select %57, %58, %30 : vector<32x128xi1>, vector<32x128xf32>
      %c0_20 = arith.constant 0 : index
      %c3 = arith.constant 3 : index
      %60 = vector.load %arg15[%c0_20, %c3] : memref<32x6xf32, #tpu.memory_space<vmem>>, vector<32x1xf32>
      tpu.vector_store %arg15[%c0_20, %c3], %49 {strides = array<i32>} : memref<32x6xf32, #tpu.memory_space<vmem>>, vector<32x1xf32>,
      %cst_21 = arith.constant dense<0x7F800000> : vector<32xf32>
      %61 = vector.multi_reduction <minimumf>, %59, %cst_21 [1] : vector<32x128xf32> to vector<32xf32>
      %62 = vector.shape_cast %61 : vector<32xf32> to vector<32x1xf32>
      %63 = vector.broadcast %62 : vector<32x1xf32> to vector<32x128xf32>
      %64 = arith.cmpf oeq, %59, %63 : vector<32x128xf32>
      %c128_i32_22 = arith.constant 128 : i32
      %65 = vector.broadcast %c128_i32_22 : i32 to vector<32x128xi32>
      %66 = arith.select %64, %47, %65 : vector<32x128xi1>, vector<32x128xi32>
      %cst_23 = arith.constant dense<2147483647> : vector<32xi32>
      %67 = vector.multi_reduction <minsi>, %66, %cst_23 [1] : vector<32x128xi32> to vector<32xi32>
      %68 = vector.shape_cast %67 : vector<32xi32> to vector<32x1xi32>
      %69 = vector.broadcast %68 : vector<32x1xi32> to vector<32x128xi32>
      %70 = arith.cmpi eq, %47, %69 : vector<32x128xi32>
      %71 = vector.broadcast %cst_12 : f32 to vector<32x128xf32>
      %72 = arith.select %70, %71, %59 : vector<32x128xi1>, vector<32x128xf32>
      %c0_24 = arith.constant 0 : index
      %c4 = arith.constant 4 : index
      %73 = vector.load %arg15[%c0_24, %c4] : memref<32x6xf32, #tpu.memory_space<vmem>>, vector<32x1xf32>
      tpu.vector_store %arg15[%c0_24, %c4], %62 {strides = array<i32>} : memref<32x6xf32, #tpu.memory_space<vmem>>, vector<32x1xf32>,
      %cst_25 = arith.constant dense<0x7F800000> : vector<32xf32>
      %74 = vector.multi_reduction <minimumf>, %72, %cst_25 [1] : vector<32x128xf32> to vector<32xf32>
      %75 = vector.shape_cast %74 : vector<32xf32> to vector<32x1xf32>
      %c0_26 = arith.constant 0 : index
      %c5 = arith.constant 5 : index
      %76 = vector.load %arg15[%c0_26, %c5] : memref<32x6xf32, #tpu.memory_space<vmem>>, vector<32x1xf32>
      tpu.vector_store %arg15[%c0_26, %c5], %75 {strides = array<i32>} : memref<32x6xf32, #tpu.memory_space<vmem>>, vector<32x1xf32>,
      %c0_27 = arith.constant 0 : index
      %c0_28 = arith.constant 0 : index
      %77 = vector.load %arg15[%c0_27, %c0_28] : memref<32x6xf32, #tpu.memory_space<vmem>>, vector<32x6xf32>
      %78 = tpu.iota {dimensions = array<i32: 1>} : vector<32x6xi32>
      %cst_29 = arith.constant dense<0x7F800000> : vector<32xf32>
      %79 = vector.multi_reduction <minimumf>, %77, %cst_29 [1] : vector<32x6xf32> to vector<32xf32>
      %80 = vector.shape_cast %79 : vector<32xf32> to vector<32x1xf32>
      %81 = vector.broadcast %80 : vector<32x1xf32> to vector<32x6xf32>
      %82 = arith.cmpf oeq, %77, %81 : vector<32x6xf32>
      %c6_i32 = arith.constant 6 : i32
      %83 = vector.broadcast %c6_i32 : i32 to vector<32x6xi32>
      %84 = arith.select %82, %78, %83 : vector<32x6xi1>, vector<32x6xi32>
      %cst_30 = arith.constant dense<2147483647> : vector<32xi32>
      %85 = vector.multi_reduction <minsi>, %84, %cst_30 [1] : vector<32x6xi32> to vector<32xi32>
      %86 = vector.shape_cast %85 : vector<32xi32> to vector<32x1xi32>
      %87 = vector.broadcast %86 : vector<32x1xi32> to vector<32x6xi32>
      %88 = arith.cmpi eq, %78, %87 : vector<32x6xi32>
      %89 = vector.broadcast %cst_12 : f32 to vector<32x6xf32>
      %90 = arith.select %88, %89, %77 : vector<32x6xi1>, vector<32x6xf32>
      %c0_31 = arith.constant 0 : index
      %c0_32 = arith.constant 0 : index
      %91 = vector.load %arg15[%c0_31, %c0_32] : memref<32x6xf32, #tpu.memory_space<vmem>>, vector<32x1xf32>
      tpu.vector_store %arg15[%c0_31, %c0_32], %80 {strides = array<i32>} : memref<32x6xf32, #tpu.memory_space<vmem>>, vector<32x1xf32>,
      %cst_33 = arith.constant dense<0x7F800000> : vector<32xf32>
      %92 = vector.multi_reduction <minimumf>, %90, %cst_33 [1] : vector<32x6xf32> to vector<32xf32>
      %93 = vector.shape_cast %92 : vector<32xf32> to vector<32x1xf32>
      %94 = vector.broadcast %93 : vector<32x1xf32> to vector<32x6xf32>
      %95 = arith.cmpf oeq, %90, %94 : vector<32x6xf32>
      %c6_i32_34 = arith.constant 6 : i32
      %96 = vector.broadcast %c6_i32_34 : i32 to vector<32x6xi32>
      %97 = arith.select %95, %78, %96 : vector<32x6xi1>, vector<32x6xi32>
      %cst_35 = arith.constant dense<2147483647> : vector<32xi32>
      %98 = vector.multi_reduction <minsi>, %97, %cst_35 [1] : vector<32x6xi32> to vector<32xi32>
      %99 = vector.shape_cast %98 : vector<32xi32> to vector<32x1xi32>
      %100 = vector.broadcast %99 : vector<32x1xi32> to vector<32x6xi32>
      %101 = arith.cmpi eq, %78, %100 : vector<32x6xi32>
      %102 = vector.broadcast %cst_12 : f32 to vector<32x6xf32>
      %103 = arith.select %101, %102, %90 : vector<32x6xi1>, vector<32x6xf32>
      %c0_36 = arith.constant 0 : index
      %c1 = arith.constant 1 : index
      %104 = vector.load %arg15[%c0_36, %c1] : memref<32x6xf32, #tpu.memory_space<vmem>>, vector<32x1xf32>
      tpu.vector_store %arg15[%c0_36, %c1], %93 {strides = array<i32>} : memref<32x6xf32, #tpu.memory_space<vmem>>, vector<32x1xf32>,
      %cst_37 = arith.constant dense<0x7F800000> : vector<32xf32>
      %105 = vector.multi_reduction <minimumf>, %103, %cst_37 [1] : vector<32x6xf32> to vector<32xf32>
      %106 = vector.shape_cast %105 : vector<32xf32> to vector<32x1xf32>
      %c0_38 = arith.constant 0 : index
      %c2 = arith.constant 2 : index
      %107 = vector.load %arg15[%c0_38, %c2] : memref<32x6xf32, #tpu.memory_space<vmem>>, vector<32x1xf32>
      tpu.vector_store %arg15[%c0_38, %c2], %106 {strides = array<i32>} : memref<32x6xf32, #tpu.memory_space<vmem>>, vector<32x1xf32>,
    } else {
    }
    %c1_i32 = arith.constant 1 : i32
    %39 = arith.cmpi eq, %arg1, %c1_i32 : i32
    %40 = arith.extui %39 : i1 to i32
    %c0_i32_14 = arith.constant 0 : i32
    %41 = arith.cmpi ne, %40, %c0_i32_14 : i32
    scf.if %41 {
      %c0_18 = arith.constant 0 : index
      %c0_19 = arith.constant 0 : index
      %47 = vector.load %arg15[%c0_18, %c0_19] : memref<32x6xf32, #tpu.memory_space<vmem>>, vector<32x3xf32>
      %cst_20 = arith.constant dense<0xFF800000> : vector<32xf32>
      %48 = vector.multi_reduction <maximumf>, %47, %cst_20 [1] : vector<32x3xf32> to vector<32xf32>
      %49 = vector.shape_cast %48 : vector<32xf32> to vector<32x1xf32>
      %50 = vector.broadcast %49 : vector<32x1xf32> to vector<32x128xf32>
      %51 = arith.cmpf ole, %30, %50 : vector<32x128xf32>
      %52 = arith.andi %28, %51 : vector<32x128xi1>
      %cst_21 = arith.constant 1.000000e-16 : f32
      %53 = vector.broadcast %cst_21 : f32 to vector<32x128xf32>
      %54 = arith.maximumf %23, %53 : vector<32x128xf32>
      %55 = tpu.reciprocal %54 {approx = true} : vector<32x128xf32> -> vector<32x128xf32>
      %cst_22 = arith.constant 0.000000e+00 : f32
      %56 = vector.broadcast %cst_22 : f32 to vector<32x128xf32>
      %57 = arith.select %52, %55, %56 : vector<32x128xi1>, vector<32x128xf32>
      %c0_23 = arith.constant 0 : index
      %c0_24 = arith.constant 0 : index
      %58 = vector.load %arg16[%c0_23, %c0_24] : memref<32x5xf32, #tpu.memory_space<vmem>>, vector<32x5xf32>
      %c0_25 = arith.constant 0 : index
      %c0_26 = arith.constant 0 : index
      %59 = vector.load %arg3[%c0_25, %c0_26] : memref<128x5xf32, #tpu.memory_space<vmem>>, vector<128x5xf32>
      %cst_27 = arith.constant dense<0.000000e+00> : vector<32x5xf32>
      %60 = tpu.matmul %57, %59, %cst_27 {dimension_numbers = #tpu.dot_dimension_numbers<[1], [0], [0], [1], [0, 0, 1, 1], [], []>} : vector<32x128xf32>, vector<128x5xf32>, vector<32x5xf32> -> vector<32x5xf32>
      %61 = arith.addf %58, %60 : vector<32x5xf32>
      %c0_28 = arith.constant 0 : index
      %c0_29 = arith.constant 0 : index
      %62 = vector.load %arg16[%c0_28, %c0_29] : memref<32x5xf32, #tpu.memory_space<vmem>>, vector<32x5xf32>
      tpu.vector_store %arg16[%c0_28, %c0_29], %61 {strides = array<i32>} : memref<32x5xf32, #tpu.memory_space<vmem>>, vector<32x5xf32>,
    } else {
    }
    %c1_i32_15 = arith.constant 1 : i32
    %42 = arith.cmpi eq, %arg1, %c1_i32_15 : i32
    %c0_i32_16 = arith.constant 0 : i32
    %43 = arith.cmpi eq, %arg2, %c0_i32_16 : i32
    %44 = arith.andi %42, %43 : i1
    %45 = arith.extui %44 : i1 to i32
    %c0_i32_17 = arith.constant 0 : i32
    %46 = arith.cmpi ne, %45, %c0_i32_17 : i32
    scf.if %46 {
      %c0_18 = arith.constant 0 : index
      %c0_19 = arith.constant 0 : index
      %47 = vector.load %arg16[%c0_18, %c0_19] : memref<32x5xf32, #tpu.memory_space<vmem>>, vector<32x5xf32>
      %48 = vector.extract_strided_slice %47 {offsets = [0, 4], sizes = [32, 1], strides = [1, 1]} : vector<32x5xf32> to vector<32x1xf32>
      %cst_20 = arith.constant 1.000000e-30 : f32
      %49 = vector.broadcast %cst_20 : f32 to vector<32x1xf32>
      %50 = arith.maximumf %48, %49 : vector<32x1xf32>
      %51 = vector.broadcast %50 : vector<32x1xf32> to vector<32x5xf32>
      %52 = arith.divf %47, %51 : vector<32x5xf32>
      %c0_21 = arith.constant 0 : index
      %c0_22 = arith.constant 0 : index
      %53 = vector.load %arg9[%c0_21, %c0_22] : memref<5x128xf32, #tpu.memory_space<vmem>>, vector<5x128xf32>
      %cst_23 = arith.constant dense<0.000000e+00> : vector<32x128xf32>
      %54 = tpu.matmul %52, %53, %cst_23 {dimension_numbers = #tpu.dot_dimension_numbers<[1], [0], [0], [1], [0, 0, 1, 1], [], []>} : vector<32x5xf32>, vector<5x128xf32>, vector<32x128xf32> -> vector<32x128xf32>
      %c0_24 = arith.constant 0 : index
      %c0_25 = arith.constant 0 : index
      %55 = vector.load %arg8[%c0_24, %c0_25] : memref<32x8xf32, #tpu.memory_space<vmem>>, vector<32x8xf32>
      %c0_26 = arith.constant 0 : index
      %c0_27 = arith.constant 0 : index
      %56 = vector.load %arg10[%c0_26, %c0_27] : memref<8x128xf32, #tpu.memory_space<vmem>>, vector<8x128xf32>
      %cst_28 = arith.constant dense<0.000000e+00> : vector<32x128xf32>
      %57 = tpu.matmul %55, %56, %cst_28 {dimension_numbers = #tpu.dot_dimension_numbers<[1], [0], [0], [1], [0, 0, 1, 1], [], []>} : vector<32x8xf32>, vector<8x128xf32>, vector<32x128xf32> -> vector<32x128xf32>
      %58 = arith.addf %54, %57 : vector<32x128xf32>
      %c0_29 = arith.constant 0 : index
      %c0_30 = arith.constant 0 : index
      %59 = vector.load %arg11[%c0_29, %c0_30] : memref<1x128xf32, #tpu.memory_space<vmem>>, vector<1x128xf32>
      %60 = vector.broadcast %59 : vector<1x128xf32> to vector<32x128xf32>
      %61 = arith.addf %58, %60 : vector<32x128xf32>
      %cst_31 = arith.constant 0.000000e+00 : f32
      %62 = vector.broadcast %cst_31 : f32 to vector<32x128xf32>
      %63 = arith.maximumf %61, %62 : vector<32x128xf32>
      %c0_32 = arith.constant 0 : index
      %c0_33 = arith.constant 0 : index
      %64 = vector.load %arg12[%c0_32, %c0_33] : memref<128x128xf32, #tpu.memory_space<vmem>>, vector<128x128xf32>
      %cst_34 = arith.constant dense<0.000000e+00> : vector<32x128xf32>
      %65 = tpu.matmul %63, %64, %cst_34 {dimension_numbers = #tpu.dot_dimension_numbers<[1], [0], [0], [1], [0, 0, 1, 1], [], []>} : vector<32x128xf32>, vector<128x128xf32>, vector<32x128xf32> -> vector<32x128xf32>
      %c0_35 = arith.constant 0 : index
      %c0_36 = arith.constant 0 : index
      %66 = vector.load %arg13[%c0_35, %c0_36] : memref<1x128xf32, #tpu.memory_space<vmem>>, vector<1x128xf32>
      %67 = vector.broadcast %66 : vector<1x128xf32> to vector<32x128xf32>
      %68 = arith.addf %65, %67 : vector<32x128xf32>
      %c0_37 = arith.constant 0 : index
      %c0_38 = arith.constant 0 : index
      %69 = vector.load %arg14[%c0_37, %c0_38] : memref<32x128xf32, #tpu.memory_space<vmem>>, vector<32x128xf32>
      tpu.vector_store %arg14[%c0_37, %c0_38], %68 {strides = array<i32>} : memref<32x128xf32, #tpu.memory_space<vmem>>, vector<32x128xf32>,
    } else {
    }
    return
  }
  func.func @transform_0(%arg0: i32, %arg1: i32, %arg2: i32) -> (i32, i32) {
    %0 = arith.muli %arg2, %arg1 : i32
    %c0_i32 = arith.constant 0 : i32
    %c0_i32_0 = arith.constant 0 : i32
    return %0, %c0_i32 : i32, i32
  }
  func.func @transform_1(%arg0: i32, %arg1: i32, %arg2: i32) -> (i32, i32) {
    %c0_i32 = arith.constant 0 : i32
    %c0_i32_0 = arith.constant 0 : i32
    return %c0_i32, %arg2 : i32, i32
  }
  func.func @transform_2(%arg0: i32, %arg1: i32, %arg2: i32) -> (i32, i32) {
    %c0_i32 = arith.constant 0 : i32
    %c0_i32_0 = arith.constant 0 : i32
    return %c0_i32, %arg2 : i32, i32
  }
  func.func @transform_3(%arg0: i32, %arg1: i32, %arg2: i32) -> (i32, i32) {
    %c0_i32 = arith.constant 0 : i32
    %c0_i32_0 = arith.constant 0 : i32
    return %arg0, %c0_i32 : i32, i32
  }
  func.func @transform_4(%arg0: i32, %arg1: i32, %arg2: i32) -> (i32, i32) {
    %c0_i32 = arith.constant 0 : i32
    %c0_i32_0 = arith.constant 0 : i32
    return %arg0, %c0_i32 : i32, i32
  }
  func.func @transform_5(%arg0: i32, %arg1: i32, %arg2: i32) -> (i32, i32) {
    %c0_i32 = arith.constant 0 : i32
    %c0_i32_0 = arith.constant 0 : i32
    return %arg0, %c0_i32 : i32, i32
  }
  func.func @transform_6(%arg0: i32, %arg1: i32, %arg2: i32) -> (i32, i32) {
    %c0_i32 = arith.constant 0 : i32
    %c0_i32_0 = arith.constant 0 : i32
    %c0_i32_1 = arith.constant 0 : i32
    return %c0_i32, %c0_i32_0 : i32, i32
  }
  func.func @transform_7(%arg0: i32, %arg1: i32, %arg2: i32) -> (i32, i32) {
    %c0_i32 = arith.constant 0 : i32
    %c0_i32_0 = arith.constant 0 : i32
    %c0_i32_1 = arith.constant 0 : i32
    return %c0_i32, %c0_i32_0 : i32, i32
  }
  func.func @transform_8(%arg0: i32, %arg1: i32, %arg2: i32) -> (i32, i32) {
    %c0_i32 = arith.constant 0 : i32
    %c0_i32_0 = arith.constant 0 : i32
    %c0_i32_1 = arith.constant 0 : i32
    return %c0_i32, %c0_i32_0 : i32, i32
  }
  func.func @transform_9(%arg0: i32, %arg1: i32, %arg2: i32) -> (i32, i32) {
    %c0_i32 = arith.constant 0 : i32
    %c0_i32_0 = arith.constant 0 : i32
    %c0_i32_1 = arith.constant 0 : i32
    return %c0_i32, %c0_i32_0 : i32, i32
  }
  func.func @transform_10(%arg0: i32, %arg1: i32, %arg2: i32) -> (i32, i32) {
    %c0_i32 = arith.constant 0 : i32
    %c0_i32_0 = arith.constant 0 : i32
    %c0_i32_1 = arith.constant 0 : i32
    return %c0_i32, %c0_i32_0 : i32, i32
  }
  func.func @transform_11(%arg0: i32, %arg1: i32, %arg2: i32) -> (i32, i32) {
    %c0_i32 = arith.constant 0 : i32
    %c0_i32_0 = arith.constant 0 : i32
    return %arg0, %c0_i32 : i32, i32
  }
}

</mosaic_0001>

<bundles_post_ra>
// kernel: tpu_custom_call.1
= control target key start
LH: loop header
LB: loop body
LE: loop exit
PB: predicated region body
PF: predicated region fallthrough
CT: control target
= control target key end

     0   :  { %16 = vsyncpa [#allocation6], 0  ;;  %s2169_s17 = smov 0   ;;  %s2171_s18 = smov 0   ;;  %s2615_s0 = inlined_call_operand.vmem [shape: f32[128,5], index: 0, kind: input, shape index: {}]   ;;  %s2616_s1 = inlined_call_operand.vmem [shape: f32[3,128], index: 1, kind: input, shape index: {}]   ;;  %s2617_s2 = inlined_call_operand.vmem [shape: s32[1,128], index: 2, kind: input, shape index: {}]   ;;  %s2618_s3 = inlined_call_operand.vmem [shape: f32[32,3], index: 3, kind: input, shape index: {}]   ;;  %s2619_s4 = inlined_call_operand.vmem [shape: s32[32,1], index: 4, kind: input, shape index: {}]   ;;  %s2620_s5 = inlined_call_operand.vmem [shape: f32[32,8], index: 5, kind: input, shape index: {}]   ;;  %s2621_s6 = inlined_call_operand.vmem [shape: f32[5,128], index: 6, kind: input, shape index: {}]   ;;  %s2622_s7 = inlined_call_operand.vmem [shape: f32[8,128], index: 7, kind: input, shape index: {}]   ;;  %s2623_s8 = inlined_call_operand.vmem [shape: f32[1,128], index: 8, kind: input, shape index: {}]   ;;  %s2624_s9 = inlined_call_operand.vmem [shape: f32[128,128], index: 9, kind: input, shape index: {}]   ;;  %s2625_s10 = inlined_call_operand.vmem [shape: f32[1,128], index: 10, kind: input, shape index: {}]   ;;  %s2626_s11 = inlined_call_operand.hbm [shape: f32[32,128], index: 11, kind: output, shape index: {}]  }
   0x1   :  { %s2173_s19 = smov 0  }
   0x2 LB: > { %s1720_s20 = sadd.s32 4294967295, %s2098_s19   ;;  %s37_s21 = sadd.s32 1, %s2094_s18  ;;  %s2098_s19 = sphi %s2173_s19, %s22_s19   ;;  %s2094_s18 = sphi %s2171_s18, %s2629_s18   ;;  %s2090_s17 = sphi %s2169_s17, %s2628_s17  }
   0x3   : > { %p39_p0 = scmp.ge.s32.totalorder %s37_s21, 2  ;;  %p1729_p1 = scmp.ge.s32.totalorder %s2098_s19, 1 }
   0x4   : > { %p412_p2 = scmp.lt.s32.totalorder %s2098_s19, 3 }
   0x5   : > { %s2631_s21 = smov (%p39_p0, %s37_s21), 0 }
   0x6   : > { %p413_p3 = pnand %p1729_p1, %p412_p2 }
   0x7   : > { %v506_v0 = vld [vmem:[%s2618_s3 + $0x10] sm:$0xff] (!%p413_p3)  ;;  %v504_v1 = vld [vmem:[%s2618_s3] sm:$0xff] (!%p413_p3)  ;;  %v2100_v2 = vmov (!%p413_p3), 1   ;;  %v2101_v3 = vmov (!%p413_p3), 0   ;;  %v507_v4 = vld [vmem:[%s2618_s3 + $0x18] sm:$0xff] (!%p413_p3)  ;;  %v2102_v6 = vmov (!%p413_p3), 2   ;;  %v529_v13 = vlaneseq (!%p413_p3) }
   0x8   : > { %416 = sbr.rel (%p413_p3) target bundleno = 3224 (0xc98), region = 64  ;;  %2022 = vset.pattern.permute.xlu0 (!%p413_p3), %v2100_v2  ;;  %2021 = vset.pattern.permute.xlu1 (!%p413_p3), %v2101_v3  ;;  %v505_v5 = vld [vmem:[%s2618_s3 + $0x8] sm:$0xff] (!%p413_p3)  ;;  %v609_v7 = vld [vmem:[%s2619_s4] sm:$0xff] (!%p413_p3)  ;;  %v612_v8 = vld [vmem:[%s2619_s4 + $0x18] sm:$0xff] (!%p413_p3)  ;;  %p638_p4 = scmp.eq.s32.totalorder (!%p413_p3), %s2090_s17, 0 }
   0x9   : > { %521 = vperm.xlu1 (!%p413_p3), %2021, %v506_v0   ;;  %546 = vperm.xlu0 (!%p413_p3), %2022, %v504_v1   ;;  %v610_v9 = vld [vmem:[%s2619_s4 + $0x8] sm:$0xff] (!%p413_p3)  ;;  %v611_v10 = vld [vmem:[%s2619_s4 + $0x10] sm:$0xff] (!%p413_p3)  ;;  %v530_v15 = vshrl.u32 (!%p413_p3), %v529_v13, 7  ;;  %v508_v21 = vld [vmem:[%s2616_s1] sm:$0x7] (!%p413_p3) }
   0xa   : > { %v2222_v38 = vld [vmem:[%s2617_s2] ss:$0 sm:$0xff] (!%p413_p3) }
   0xb   : > { %v531_v17 = vsub.s32 (!%p413_p3), 0, %v530_v15  ;;  %v563_v18 = vsub.s32 (!%p413_p3), 1, %v530_v15  ;;  %v595_v22 = vsub.s32 (!%p413_p3), 2, %v530_v15 }
   0xd   : > { %526 = vperm.xlu1 (!%p413_p3), %2021, %v507_v4   ;;  %558 = vperm.xlu0 (!%p413_p3), %2022, %v507_v4   ;;  %v532_v23 = vrot.slane (!%p413_p3), %v508_v21, %v531_v17  ;;  %v564_v24 = vrot.slane (!%p413_p3), %v508_v21, %v563_v18  ;;  %v596_v28 = vrot.slane (!%p413_p3), %v508_v21, %v595_v22 }
   0xf   : > { %vm644_vm4 = vcmask (%p638_p4), 48128   ;;  %vm649_vm5 = vcmask (%p638_p4), 39936  }
  0x11   : > { %2023 = vset.pattern.permute.xlu1 %v2100_v2  ;;  %2025 = vset.pattern.permute.xlu0 %v2102_v6 }
  0x12   : > { %550 = vperm.xlu1 %2023, %v505_v5   ;;  %582 = vperm.xlu0 %2025, %v505_v5  }
  0x16   : > { %554 = vperm.xlu1 %2023, %v506_v0   ;;  %2026 = vset.pattern.permute.xlu0 %v2101_v3 }
  0x17   : > { %511 = vperm.xlu0 %2026, %v504_v1  }
  0x1a   : > { %2024 = vset.pattern.permute.xlu1 %v2102_v6 }
  0x1b   : > { %578 = vperm.xlu1 %2024, %v504_v1   ;;  %516 = vperm.xlu0 %2026, %v505_v5  }
  0x1f   : > { %586 = vperm.xlu1 %2024, %v506_v0   ;;  %615 = vperm.xlu0 %2026, %v609_v7  }
  0x23   : > { %590 = vperm.xlu1 %2024, %v507_v4   ;;  %624 = vperm.xlu0 %2026, %v612_v8  }
  0x27   : > { %2027 = vset.pattern.permute.xlu1 %v2101_v3 }
  0x28   : > { %618 = vperm.xlu1 %2027, %v610_v9   ;;  %v2103_v9 = vmov (%p638_p4), inf  }
  0x29   : > { %645 = vst.msk [vmem:[#allocation2] sm:$0xff] (%p638_p4), %vm644_vm4, %v2103_v9  ;;  %646 = vst.msk [vmem:[#allocation2 + $0x8] sm:$0xff] (%p638_p4), %vm644_vm4, %v2103_v9 }
  0x2a   : > { %647 = vst.msk [vmem:[#allocation2 + $0x10] sm:$0xff] (%p638_p4), %vm644_vm4, %v2103_v9  ;;  %648 = vst.msk [vmem:[#allocation2 + $0x18] sm:$0xff] (%p638_p4), %vm644_vm4, %v2103_v9 }
  0x2c   : > { %621 = vperm.xlu1 %2027, %v611_v10   ;;  %v2104_v10 = vmov (%p638_p4), 0.0  }
  0x2d   : > { %650 = vst.msk [vmem:[#allocation3] sm:$0xff] (%p638_p4), %vm649_vm5, %v2104_v10  ;;  %651 = vst.msk [vmem:[#allocation3 + $0x8] sm:$0xff] (%p638_p4), %vm649_vm5, %v2104_v10 }
  0x2e   : > { %652 = vst.msk [vmem:[#allocation3 + $0x10] sm:$0xff] (%p638_p4), %vm649_vm5, %v2104_v10  ;;  %653 = vst.msk [vmem:[#allocation3 + $0x18] sm:$0xff] (%p638_p4), %vm649_vm5, %v2104_v10 }
  0x88   : > { %v522_v11 = vpop.permute.xlu1 %521  ;;  %v547_v12 = vpop.permute.xlu0 %546 }
  0x89   : > { %v565_v27 = vsub.f32 %v547_v12, %v564_v24  ;;  %v535_v53 = vsub.f32 %v522_v11, %v532_v23 }
  0x8b   : > { %v569_v33 = vmul.f32 %v565_v27, %v565_v27  ;;  %v539_v62 = vmul.f32 %v535_v53, %v535_v53 }
  0x8c   : > { %v527_v14 = vpop.permute.xlu1 %526  ;;  %v559_v16 = vpop.permute.xlu0 %558 }
  0x8d   : > { %v536_v36 = vsub.f32 %v527_v14, %v532_v23  ;;  %v568_v37 = vsub.f32 %v559_v16, %v564_v24 }
  0x8f   : > { %v540_v46 = vmul.f32 %v536_v36, %v536_v36  ;;  %v572_v47 = vmul.f32 %v568_v37, %v568_v37 }
  0x91   : > { %v551_v19 = vpop.permute.xlu1 %550  ;;  %v583_v20 = vpop.permute.xlu0 %582  ;;  %v576_v57 = vadd.f32 %v572_v47, %v540_v46 }
  0x92   : > { %v566_v39 = vsub.f32 %v551_v19, %v564_v24  ;;  %v598_v49 = vsub.f32 %v583_v20, %v596_v28 }
  0x94   : > { %v570_v48 = vmul.f32 %v566_v39, %v566_v39  ;;  %v602_v58 = vmul.f32 %v598_v49, %v598_v49 }
  0x95   : > { %v555_v25 = vpop.permute.xlu1 %554 }
  0x96   : > { %v512_v26 = vpop.permute.xlu0 %511  ;;  %v567_v50 = vsub.f32 %v555_v25, %v564_v24 }
  0x97   : > { %v533_v29 = vsub.f32 %v512_v26, %v532_v23 }
  0x98   : > { %v571_v59 = vmul.f32 %v567_v50, %v567_v50 }
  0x99   : > { %v537_v30 = vmul.f32 %v533_v29, %v533_v29 }
  0x9a   : > { %v579_v31 = vpop.permute.xlu1 %578  ;;  %v517_v32 = vpop.permute.xlu0 %516  ;;  %v575_v3 = vadd.f32 %v571_v59, %v539_v62 }
  0x9b   : > { %v597_v34 = vsub.f32 %v579_v31, %v596_v28  ;;  %v534_v35 = vsub.f32 %v517_v32, %v532_v23  ;;  %v573_v40 = vadd.f32 %v569_v33, %v537_v30 }
  0x9d   : > { %v601_v41 = vmul.f32 %v597_v34, %v597_v34  ;;  %v538_v45 = vmul.f32 %v534_v35, %v534_v35 }
  0x9e   : > { %v587_v42 = vpop.permute.xlu1 %586  ;;  %v2224_v43 = vpop.permute.xlu0 %615 }
  0x9f   : > { %v2226_v44 = vadd.f32 %v601_v41, %v573_v40  ;;  %vm630_vm0 = vcmp.eq.s32.totalorder %v2224_v43, %v2222_v38  ;;  %v574_v54 = vadd.f32 %v570_v48, %v538_v45  ;;  %v599_v55 = vsub.f32 %v587_v42, %v596_v28 }
  0xa1   : > { %v2234_v51 = vsel %vm630_vm0, %v2226_v44, inf  ;;  %v603_v63 = vmul.f32 %v599_v55, %v599_v55  ;;  %v2242_v2 = vadd.f32 %v602_v58, %v574_v54 }
  0xa2   : > { %v591_v52 = vpop.permute.xlu1 %590  ;;  %v2236_v61 = vpop.permute.xlu0 %624 }
  0xa3   : > { %v600_v56 = vsub.f32 %v591_v52, %v596_v28  ;;  %vm633_vm1 = vcmp.eq.s32.totalorder %v2236_v61, %v2222_v38  ;;  %v2260_v6 = vadd.f32 %v603_v63, %v575_v3 }
  0xa5   : > { %v604_v60 = vmul.f32 %v600_v56, %v600_v56 }
  0xa7   : > { %v2238_v0 = vadd.f32 %v604_v60, %v576_v57  ;;  %v2240_v1 = vpop.permute.xlu1 %618  ;;  %643 = sbr.rel (!%p638_p4) target bundleno = 174 (0xae), region = 68 }
  0xa8   : > { %vm631_vm2 = vcmp.eq.s32.totalorder %v2240_v1, %v2222_v38 }
  0xa9   : > { %v2252_v4 = vsel %vm633_vm1, %v2238_v0, inf  ;;  %v2258_v5 = vsel %vm631_vm2, %v2242_v2, inf }
  0xab   : > { %v2262_v7 = vpop.permute.xlu1 %621 }
  0xac   : > { %vm632_vm3 = vcmp.eq.s32.totalorder %v2262_v7, %v2222_v38 }
  0xad   : > { %v2270_v8 = vsel %vm632_vm3, %v2260_v6, inf }
  0xae PF: > { %p1732_p5 = scmp.ne.s32.totalorder %s2090_s17, 0 }
  0xaf   : > { %664 = vmin.xlane.f32.xlu0 (!%p1732_p5), %v2234_v51  ;;  %668 = vmin.xlane.f32.xlu1 (!%p1732_p5), %v2270_v8  ;;  %v2280_v11 = vand.u32 (!%p1732_p5), 127, %v529_v13  ;;  %vm744_vm6 = vcmask (!%p1732_p5), 31768  }
  0xb0   : > { %661 = sbr.rel (%p1732_p5) target bundleno = 2241 (0x8c1), region = 72 }
  0xb3   : > { %666 = vmin.xlane.f32.xlu0 (!%p1732_p5), %v2258_v5  ;;  %670 = vmin.xlane.f32.xlu1 (!%p1732_p5), %v2252_v4 }
 0x13c   : > { %v665_v12 = vpop.xlane.xlu0 %664  ;;  %v669_v14 = vpop.xlane.xlu1 %668 }
 0x13d   : > { %vm672_vm7 = vcmp.eq.f32.partialorder %v2234_v51, %v665_v12  ;;  %745 = vst.msk [vmem:[#allocation2] sm:$0xff] %vm744_vm6, %v665_v12  ;;  %vm674_vm8 = vcmp.eq.f32.partialorder %v2270_v8, %v669_v14  ;;  %747 = vst.msk [vmem:[#allocation2 + $0x10] sm:$0xff] %vm744_vm6, %v669_v14 }
 0x13e   : > { %v676_v15 = vsel %vm672_vm7, %v2280_v11, 128  ;;  %v678_v16 = vsel %vm674_vm8, %v2280_v11, 128  ;;  %vm829_vm7 = vcmask 39968  }
 0x13f   : > { %v681_v17 = vshra.s32 %v676_v15, 16  ;;  %v709_v18 = vshra.s32 %v678_v16, 16  ;;  %v680_v28 = vand.u32 65535, %v676_v15  ;;  %v708_v32 = vand.u32 65535, %v678_v16 }
 0x140   : > { %v667_v19 = vpop.xlane.xlu0 %666  ;;  %v671_v13 = vpop.xlane.xlu1 %670 }
 0x141   : > { %vm673_vm9 = vcmp.eq.f32.partialorder %v2258_v5, %v667_v19  ;;  %746 = vst.msk [vmem:[#allocation2 + $0x8] sm:$0xff] %vm744_vm6, %v667_v19  ;;  %v683_v20 = vcvt.s32.f32 %v681_v17  ;;  %vm675_vm10 = vcmp.eq.f32.partialorder %v2252_v4, %v671_v13  ;;  %748 = vst.msk [vmem:[#allocation2 + $0x18] sm:$0xff] %vm744_vm6, %v671_v13  ;;  %v711_v24 = vcvt.s32.f32 %v709_v18 }
 0x142   : > { %v677_v21 = vsel %vm673_vm9, %v2280_v11, 128  ;;  %v679_v22 = vsel %vm675_vm10, %v2280_v11, 128  ;;  %v682_v30 = vcvt.s32.f32 %v680_v28  ;;  %v710_v37 = vcvt.s32.f32 %v708_v32 }
 0x143   : > { %684 = vmin.xlane.f32.xlu0 %v683_v20  ;;  %v695_v23 = vshra.s32 %v677_v21, 16  ;;  %v723_v25 = vshra.s32 %v679_v22, 16  ;;  %v694_v31 = vand.u32 65535, %v677_v21  ;;  %v722_v39 = vand.u32 65535, %v679_v22 }
 0x145   : > { %v697_v26 = vcvt.s32.f32 %v695_v23  ;;  %v725_v27 = vcvt.s32.f32 %v723_v25  ;;  %v696_v36 = vcvt.s32.f32 %v694_v31  ;;  %v724_v45 = vcvt.s32.f32 %v722_v39 }
 0x147   : > { %698 = vmin.xlane.f32.xlu1 %v697_v26  ;;  %712 = vmin.xlane.f32.xlu0 %v711_v24 }
 0x14b   : > { %726 = vmin.xlane.f32.xlu1 %v725_v27 }
 0x1d0   : > { %v685_v29 = vpop.xlane.xlu0 %684 }
 0x1d1   : > { %vm686_vm11 = vcmp.eq.f32.partialorder %v683_v20, %v685_v29  ;;  %v691_v47 = vcvt.f32.s32 %v685_v29 }
 0x1d2   : > { %v687_v33 = vsel %vm686_vm11, %v682_v30, inf }
 0x1d3   : > { %688 = vmin.xlane.f32.xlu0 %v687_v33  ;;  %v692_v52 = vshll.u32 %v691_v47, 16 }
 0x1d4   : > { %v699_v34 = vpop.xlane.xlu1 %698  ;;  %v713_v35 = vpop.xlane.xlu0 %712 }
 0x1d5   : > { %vm700_vm12 = vcmp.eq.f32.partialorder %v697_v26, %v699_v34  ;;  %vm714_vm13 = vcmp.eq.f32.partialorder %v711_v24, %v713_v35  ;;  %v705_v48 = vcvt.f32.s32 %v699_v34  ;;  %v719_v49 = vcvt.f32.s32 %v713_v35 }
 0x1d6   : > { %v701_v40 = vsel %vm700_vm12, %v696_v36, inf  ;;  %v715_v41 = vsel %vm714_vm13, %v710_v37, inf }
 0x1d7   : > { %702 = vmin.xlane.f32.xlu1 %v701_v40  ;;  %716 = vmin.xlane.f32.xlu0 %v715_v41  ;;  %v706_v55 = vshll.u32 %v705_v48, 16  ;;  %v720_v56 = vshll.u32 %v719_v49, 16 }
 0x1d8   : > { %v727_v42 = vpop.xlane.xlu1 %726 }
 0x1d9   : > { %vm728_vm14 = vcmp.eq.f32.partialorder %v725_v27, %v727_v42  ;;  %v733_v59 = vcvt.f32.s32 %v727_v42 }
 0x1da   : > { %v729_v46 = vsel %vm728_vm14, %v724_v45, inf }
 0x1db   : > { %730 = vmin.xlane.f32.xlu1 %v729_v46  ;;  %v734_v12 = vshll.u32 %v733_v59, 16 }
 0x260   : > { %v689_v50 = vpop.xlane.xlu0 %688 }
 0x261   : > { %v690_v53 = vcvt.f32.s32 %v689_v50 }
 0x263   : > { %v693_v54 = vadd.s32 %v692_v52, %v690_v53 }
 0x264   : > { %v703_v57 = vpop.xlane.xlu1 %702  ;;  %v717_v58 = vpop.xlane.xlu0 %716 }
 0x265   : > { %v704_v60 = vcvt.f32.s32 %v703_v57  ;;  %v718_v62 = vcvt.f32.s32 %v717_v58  ;;  %vm736_vm15 = vcmp.eq.s32.totalorder %v2280_v11, %v693_v54 }
 0x266   : > { %v2296_v63 = vsel %vm736_vm15, inf, %v2234_v51 }
 0x267   : > { %v707_v3 = vadd.s32 %v706_v55, %v704_v60  ;;  %v721_v9 = vadd.s32 %v720_v56, %v718_v62  ;;  %749 = vmin.xlane.f32.xlu0 %v2296_v63 }
 0x268   : > { %v731_v10 = vpop.xlane.xlu1 %730 }
 0x269   : > { %v732_v14 = vcvt.f32.s32 %v731_v10  ;;  %vm737_vm4 = vcmp.eq.s32.totalorder %v2280_v11, %v707_v3  ;;  %vm738_vm5 = vcmp.eq.s32.totalorder %v2280_v11, %v721_v9 }
 0x26a   : > { %v2302_v15 = vsel %vm737_vm4, inf, %v2258_v5  ;;  %v2305_v16 = vsel %vm738_vm5, inf, %v2270_v8 }
 0x26b   : > { %v735_v17 = vadd.s32 %v734_v12, %v732_v14  ;;  %751 = vmin.xlane.f32.xlu1 %v2302_v15  ;;  %753 = vmin.xlane.f32.xlu0 %v2305_v16 }
 0x26d   : > { %vm739_vm6 = vcmp.eq.s32.totalorder %v2280_v11, %v735_v17 }
 0x26e   : > { %v2311_v18 = vsel %vm739_vm6, inf, %v2252_v4 }
 0x26f   : > { %755 = vmin.xlane.f32.xlu1 %v2311_v18 }
 0x2f4   : > { %v750_v19 = vpop.xlane.xlu0 %749 }
 0x2f5   : > { %vm757_vm8 = vcmp.eq.f32.partialorder %v2296_v63, %v750_v19  ;;  %830 = vst.msk [vmem:[#allocation2] sm:$0xff] %vm829_vm7, %v750_v19 }
 0x2f6   : > { %v761_v13 = vsel %vm757_vm8, %v2280_v11, 128  ;;  %vm842_vm8 = vcmask 48168  }
 0x2f7   : > { %v766_v20 = vshra.s32 %v761_v13, 16  ;;  %v765_v34 = vand.u32 65535, %v761_v13 }
 0x2f8   : > { %v752_v21 = vpop.xlane.xlu1 %751  ;;  %v754_v22 = vpop.xlane.xlu0 %753 }
 0x2f9   : > { %vm758_vm9 = vcmp.eq.f32.partialorder %v2302_v15, %v752_v21  ;;  %831 = vst.msk [vmem:[#allocation2 + $0x8] sm:$0xff] %vm829_vm7, %v752_v21  ;;  %vm759_vm10 = vcmp.eq.f32.partialorder %v2305_v16, %v754_v22  ;;  %832 = vst.msk [vmem:[#allocation2 + $0x10] sm:$0xff] %vm829_vm7, %v754_v22  ;;  %v768_v23 = vcvt.s32.f32 %v766_v20  ;;  %v767_v36 = vcvt.s32.f32 %v765_v34 }
 0x2fa   : > { %v762_v24 = vsel %vm758_vm9, %v2280_v11, 128  ;;  %v763_v25 = vsel %vm759_vm10, %v2280_v11, 128  ;;  %vm851_vm9 = vcmask 48128   ;;  %vm940_vm10 = vcmask 7168  }
 0x2fb   : > { %769 = vmin.xlane.f32.xlu0 %v768_v23  ;;  %v780_v26 = vshra.s32 %v762_v24, 16  ;;  %v794_v27 = vshra.s32 %v763_v25, 16  ;;  %v779_v37 = vand.u32 65535, %v762_v24  ;;  %v793_v39 = vand.u32 65535, %v763_v25 }
 0x2fc   : > { %v756_v28 = vpop.xlane.xlu1 %755 }
 0x2fd   : > { %vm760_vm11 = vcmp.eq.f32.partialorder %v2311_v18, %v756_v28  ;;  %833 = vst.msk [vmem:[#allocation2 + $0x18] sm:$0xff] %vm829_vm7, %v756_v28  ;;  %v782_v29 = vcvt.s32.f32 %v780_v26  ;;  %v796_v30 = vcvt.s32.f32 %v794_v27  ;;  %v781_v45 = vcvt.s32.f32 %v779_v37 }
 0x2fe   : > { %v764_v31 = vsel %vm760_vm11, %v2280_v11, 128  ;;  %v795_v46 = vcvt.s32.f32 %v793_v39 }
 0x2ff   : > { %783 = vmin.xlane.f32.xlu1 %v782_v29  ;;  %797 = vmin.xlane.f32.xlu0 %v796_v30  ;;  %v808_v32 = vshra.s32 %v764_v31, 16  ;;  %v807_v47 = vand.u32 65535, %v764_v31 }
 0x301   : > { %v810_v33 = vcvt.s32.f32 %v808_v32  ;;  %v809_v52 = vcvt.s32.f32 %v807_v47 }
 0x303   : > { %811 = vmin.xlane.f32.xlu1 %v810_v33 }
 0x388   : > { %v770_v35 = vpop.xlane.xlu0 %769 }
 0x389   : > { %vm771_vm12 = vcmp.eq.f32.partialorder %v768_v23, %v770_v35  ;;  %v776_v54 = vcvt.f32.s32 %v770_v35 }
 0x38a   : > { %v772_v40 = vsel %vm771_vm12, %v767_v36, inf }
 0x38b   : > { %773 = vmin.xlane.f32.xlu0 %v772_v40  ;;  %v777_v58 = vshll.u32 %v776_v54, 16 }
 0x38c   : > { %v784_v41 = vpop.xlane.xlu1 %783  ;;  %v798_v42 = vpop.xlane.xlu0 %797 }
 0x38d   : > { %vm785_vm13 = vcmp.eq.f32.partialorder %v782_v29, %v784_v41  ;;  %vm799_vm14 = vcmp.eq.f32.partialorder %v796_v30, %v798_v42  ;;  %v790_v55 = vcvt.f32.s32 %v784_v41  ;;  %v804_v56 = vcvt.f32.s32 %v798_v42 }
 0x38e   : > { %v786_v48 = vsel %vm785_vm13, %v781_v45, inf  ;;  %v800_v49 = vsel %vm799_vm14, %v795_v46, inf }
 0x38f   : > { %787 = vmin.xlane.f32.xlu1 %v786_v48  ;;  %801 = vmin.xlane.f32.xlu0 %v800_v49  ;;  %v791_v62 = vshll.u32 %v790_v55, 16  ;;  %v805_v3 = vshll.u32 %v804_v56, 16 }
 0x390   : > { %v812_v50 = vpop.xlane.xlu1 %811 }
 0x391   : > { %vm813_vm15 = vcmp.eq.f32.partialorder %v810_v33, %v812_v50  ;;  %v818_v12 = vcvt.f32.s32 %v812_v50 }
 0x392   : > { %v814_v53 = vsel %vm813_vm15, %v809_v52, inf }
 0x393   : > { %815 = vmin.xlane.f32.xlu1 %v814_v53  ;;  %v819_v22 = vshll.u32 %v818_v12, 16 }
 0x418   : > { %v774_v57 = vpop.xlane.xlu0 %773 }
 0x419   : > { %v775_v59 = vcvt.f32.s32 %v774_v57 }
 0x41b   : > { %v778_v60 = vadd.s32 %v777_v58, %v775_v59 }
 0x41c   : > { %v788_v9 = vpop.xlane.xlu1 %787  ;;  %v802_v10 = vpop.xlane.xlu0 %801 }
 0x41d   : > { %v789_v14 = vcvt.f32.s32 %v788_v9  ;;  %v803_v17 = vcvt.f32.s32 %v802_v10  ;;  %vm821_vm4 = vcmp.eq.s32.totalorder %v2280_v11, %v778_v60 }
 0x41e   : > { %v825_v19 = vsel %vm821_vm4, inf, %v2296_v63 }
 0x41f   : > { %v792_v13 = vadd.s32 %v791_v62, %v789_v14  ;;  %v806_v20 = vadd.s32 %v805_v3, %v803_v17  ;;  %834 = vmin.xlane.f32.xlu0 %v825_v19 }
 0x420   : > { %v816_v21 = vpop.xlane.xlu1 %815 }
 0x421   : > { %v817_v23 = vcvt.f32.s32 %v816_v21  ;;  %vm822_vm5 = vcmp.eq.s32.totalorder %v2280_v11, %v792_v13  ;;  %vm823_vm6 = vcmp.eq.s32.totalorder %v2280_v11, %v806_v20 }
 0x422   : > { %v826_v24 = vsel %vm822_vm5, inf, %v2302_v15  ;;  %v827_v25 = vsel %vm823_vm6, inf, %v2305_v16 }
 0x423   : > { %v820_v26 = vadd.s32 %v819_v22, %v817_v23  ;;  %836 = vmin.xlane.f32.xlu1 %v826_v24  ;;  %838 = vmin.xlane.f32.xlu0 %v827_v25 }
 0x425   : > { %vm824_vm7 = vcmp.eq.s32.totalorder %v2280_v11, %v820_v26 }
 0x426   : > { %v828_v63 = vsel %vm824_vm7, inf, %v2311_v18 }
 0x427   : > { %840 = vmin.xlane.f32.xlu1 %v828_v63 }
 0x4ac   : > { %v835_v27 = vpop.xlane.xlu0 %834 }
 0x4ad   : > { %843 = vst.msk [vmem:[#allocation2] sm:$0xff] %vm842_vm8, %v835_v27 }
 0x4b0   : > { %v837_v28 = vpop.xlane.xlu1 %836  ;;  %v839_v29 = vpop.xlane.xlu0 %838 }
 0x4b1   : > { %844 = vst.msk [vmem:[#allocation2 + $0x8] sm:$0xff] %vm842_vm8, %v837_v28  ;;  %845 = vst.msk [vmem:[#allocation2 + $0x10] sm:$0xff] %vm842_vm8, %v839_v29 }
 0x4b4   : > { %v841_v30 = vpop.xlane.xlu1 %840  ;;  %v2334_v15 = vld [vmem:[#allocation2] sm:$0xff] }
 0x4b5   : > { %846 = vst.msk [vmem:[#allocation2 + $0x18] sm:$0xff] %vm842_vm8, %v841_v30  ;;  %v852_v16 = vsel %vm851_vm9, %v2334_v15, inf }
 0x4b6   : > { %853 = vmin.xlane.f32.xlu0 %v852_v16 }
 0x4b8   : > { %v2338_v31 = vld [vmem:[#allocation2 + $0x8] sm:$0xff]  ;;  %v2340_v18 = vld [vmem:[#allocation2 + $0x10] sm:$0xff] }
 0x4b9   : > { %v855_v32 = vsel %vm851_vm9, %v2338_v31, inf  ;;  %v858_v33 = vsel %vm851_vm9, %v2340_v18, inf }
 0x4ba   : > { %856 = vmin.xlane.f32.xlu1 %v855_v32  ;;  %859 = vmin.xlane.f32.xlu0 %v858_v33 }
 0x4bc   : > { %v2346_v34 = vld [vmem:[#allocation2 + $0x18] sm:$0xff] }
 0x4bd   : > { %v861_v35 = vsel %vm851_vm9, %v2346_v34, inf }
 0x4be   : > { %862 = vmin.xlane.f32.xlu1 %v861_v35 }
 0x543   : > { %v854_v36 = vpop.xlane.xlu0 %853 }
 0x544   : > { %vm864_vm11 = vcmp.eq.f32.partialorder %v2334_v15, %v854_v36  ;;  %941 = vst.msk [vmem:[#allocation2] sm:$0xff] %vm940_vm10, %v854_v36 }
 0x545   : > { %v868_v37 = vsel %vm864_vm11, %v2280_v11, 6 }
 0x546   : > { %v872_v39 = vsel %vm851_vm9, %v868_v37, 2147483647 }
 0x547   : > { %v857_v40 = vpop.xlane.xlu1 %856  ;;  %v860_v41 = vpop.xlane.xlu0 %859  ;;  %v874_v42 = vshra.s32 %v872_v39, 16  ;;  %v873_v60 = vand.u32 65535, %v872_v39 }
 0x548   : > { %vm865_vm12 = vcmp.eq.f32.partialorder %v2338_v31, %v857_v40  ;;  %942 = vst.msk [vmem:[#allocation2 + $0x8] sm:$0xff] %vm940_vm10, %v857_v40  ;;  %vm866_vm13 = vcmp.eq.f32.partialorder %v2340_v18, %v860_v41  ;;  %943 = vst.msk [vmem:[#allocation2 + $0x10] sm:$0xff] %vm940_vm10, %v860_v41 }
 0x549   : > { %v869_v45 = vsel %vm865_vm12, %v2280_v11, 6  ;;  %v870_v46 = vsel %vm866_vm13, %v2280_v11, 6  ;;  %v876_v47 = vcvt.s32.f32 %v874_v42  ;;  %v875_v3 = vcvt.s32.f32 %v873_v60 }
 0x54a   : > { %v887_v48 = vsel %vm851_vm9, %v869_v45, 2147483647  ;;  %v902_v49 = vsel %vm851_vm9, %v870_v46, 2147483647  ;;  %vm1033_vm12 = vcmask 15368  }
 0x54b   : > { %v863_v50 = vpop.xlane.xlu1 %862  ;;  %877 = vmin.xlane.f32.xlu0 %v876_v47  ;;  %v889_v52 = vshra.s32 %v887_v48, 16  ;;  %v904_v53 = vshra.s32 %v902_v49, 16  ;;  %v888_v9 = vand.u32 65535, %v887_v48  ;;  %v903_v10 = vand.u32 65535, %v902_v49 }
 0x54c   : > { %vm867_vm14 = vcmp.eq.f32.partialorder %v2346_v34, %v863_v50  ;;  %944 = vst.msk [vmem:[#allocation2 + $0x18] sm:$0xff] %vm940_vm10, %v863_v50 }
 0x54d   : > { %v871_v54 = vsel %vm867_vm14, %v2280_v11, 6  ;;  %v891_v55 = vcvt.s32.f32 %v889_v52  ;;  %v906_v56 = vcvt.s32.f32 %v904_v53  ;;  %v890_v19 = vcvt.s32.f32 %v888_v9 }
 0x54e   : > { %v917_v57 = vsel %vm851_vm9, %v871_v54, 2147483647  ;;  %v905_v13 = vcvt.s32.f32 %v903_v10 }
 0x54f   : > { %892 = vmin.xlane.f32.xlu1 %v891_v55  ;;  %907 = vmin.xlane.f32.xlu0 %v906_v56  ;;  %v919_v58 = vshra.s32 %v917_v57, 16  ;;  %v918_v20 = vand.u32 65535, %v917_v57 }
 0x551   : > { %v921_v59 = vcvt.s32.f32 %v919_v58  ;;  %v920_v24 = vcvt.s32.f32 %v918_v20 }
 0x553   : > { %922 = vmin.xlane.f32.xlu1 %v921_v59 }
 0x5d8   : > { %v878_v62 = vpop.xlane.xlu0 %877 }
 0x5d9   : > { %vm879_vm15 = vcmp.eq.f32.partialorder %v876_v47, %v878_v62  ;;  %v884_v26 = vcvt.f32.s32 %v878_v62 }
 0x5da   : > { %v880_v12 = vsel %vm879_vm15, %v875_v3, inf }
 0x5db   : > { %881 = vmin.xlane.f32.xlu0 %v880_v12  ;;  %v885_v29 = vshll.u32 %v884_v26, 16 }
 0x5dc   : > { %v893_v14 = vpop.xlane.xlu1 %892  ;;  %v908_v17 = vpop.xlane.xlu0 %907 }
 0x5dd   : > { %vm894_vm4 = vcmp.eq.f32.partialorder %v891_v55, %v893_v14  ;;  %vm909_vm5 = vcmp.eq.f32.partialorder %v906_v56, %v908_v17  ;;  %v899_v63 = vcvt.f32.s32 %v893_v14  ;;  %v914_v27 = vcvt.f32.s32 %v908_v17 }
 0x5de   : > { %v895_v21 = vsel %vm894_vm4, %v890_v19, inf  ;;  %v910_v22 = vsel %vm909_vm5, %v905_v13, inf }
 0x5df   : > { %896 = vmin.xlane.f32.xlu1 %v895_v21  ;;  %911 = vmin.xlane.f32.xlu0 %v910_v22  ;;  %v900_v32 = vshll.u32 %v899_v63, 16  ;;  %v915_v33 = vshll.u32 %v914_v27, 16 }
 0x5e0   : > { %v923_v23 = vpop.xlane.xlu1 %922 }
 0x5e1   : > { %vm924_vm6 = vcmp.eq.f32.partialorder %v921_v59, %v923_v23  ;;  %v929_v37 = vcvt.f32.s32 %v923_v23 }
 0x5e2   : > { %v925_v25 = vsel %vm924_vm6, %v920_v24, inf }
 0x5e3   : > { %926 = vmin.xlane.f32.xlu1 %v925_v25  ;;  %v930_v48 = vshll.u32 %v929_v37, 16 }
 0x668   : > { %v882_v28 = vpop.xlane.xlu0 %881 }
 0x669   : > { %v883_v30 = vcvt.f32.s32 %v882_v28 }
 0x66b   : > { %v886_v16 = vadd.s32 %v885_v29, %v883_v30 }
 0x66c   : > { %v897_v35 = vpop.xlane.xlu1 %896  ;;  %v912_v36 = vpop.xlane.xlu0 %911 }
 0x66d   : > { %v898_v39 = vcvt.f32.s32 %v897_v35  ;;  %v913_v40 = vcvt.f32.s32 %v912_v36  ;;  %vm932_vm7 = vcmp.eq.s32.totalorder %v2280_v11, %v886_v16 }
 0x66e   : > { %v2368_v41 = vsel %vm932_vm7, inf, %v2334_v15 }
 0x66f   : > { %v901_v42 = vadd.s32 %v900_v32, %v898_v39  ;;  %v916_v45 = vadd.s32 %v915_v33, %v913_v40  ;;  %v945_v46 = vsel %vm851_vm9, %v2368_v41, inf }
 0x670   : > { %v927_v47 = vpop.xlane.xlu1 %926  ;;  %946 = vmin.xlane.f32.xlu0 %v945_v46 }
 0x671   : > { %v928_v49 = vcvt.f32.s32 %v927_v47  ;;  %vm933_vm8 = vcmp.eq.s32.totalorder %v2280_v11, %v901_v42  ;;  %vm934_vm10 = vcmp.eq.s32.totalorder %v2280_v11, %v916_v45 }
 0x672   : > { %v2375_v50 = vsel %vm933_vm8, inf, %v2338_v31  ;;  %v2378_v52 = vsel %vm934_vm10, inf, %v2340_v18 }
 0x673   : > { %v931_v15 = vadd.s32 %v930_v48, %v928_v49  ;;  %v948_v53 = vsel %vm851_vm9, %v2375_v50, inf  ;;  %v951_v54 = vsel %vm851_vm9, %v2378_v52, inf }
 0x674   : > { %949 = vmin.xlane.f32.xlu1 %v948_v53  ;;  %952 = vmin.xlane.f32.xlu0 %v951_v54 }
 0x675   : > { %vm935_vm11 = vcmp.eq.s32.totalorder %v2280_v11, %v931_v15 }
 0x676   : > { %v2386_v55 = vsel %vm935_vm11, inf, %v2346_v34 }
 0x677   : > { %v954_v31 = vsel %vm851_vm9, %v2386_v55, inf }
 0x678   : > { %955 = vmin.xlane.f32.xlu1 %v954_v31 }
 0x6fd   : > { %v947_v18 = vpop.xlane.xlu0 %946 }
 0x6fe   : > { %vm957_vm13 = vcmp.eq.f32.partialorder %v2368_v41, %v947_v18  ;;  %1034 = vst.msk [vmem:[#allocation2] sm:$0xff] %vm1033_vm12, %v947_v18 }
 0x6ff   : > { %v961_v56 = vsel %vm957_vm13, %v2280_v11, 6 }
 0x700   : > { %v965_v57 = vsel %vm851_vm9, %v961_v56, 2147483647 }
 0x701   : > { %v950_v58 = vpop.xlane.xlu1 %949  ;;  %v953_v59 = vpop.xlane.xlu0 %952  ;;  %v967_v60 = vshra.s32 %v965_v57, 16  ;;  %v966_v24 = vand.u32 65535, %v965_v57 }
 0x702   : > { %vm958_vm14 = vcmp.eq.f32.partialorder %v2375_v50, %v950_v58  ;;  %1035 = vst.msk [vmem:[#allocation2 + $0x8] sm:$0xff] %vm1033_vm12, %v950_v58  ;;  %vm959_vm15 = vcmp.eq.f32.partialorder %v2378_v52, %v953_v59  ;;  %1036 = vst.msk [vmem:[#allocation2 + $0x10] sm:$0xff] %vm1033_vm12, %v953_v59 }
 0x703   : > { %v962_v34 = vsel %vm958_vm14, %v2280_v11, 6  ;;  %v963_v62 = vsel %vm959_vm15, %v2280_v11, 6  ;;  %v969_v3 = vcvt.s32.f32 %v967_v60  ;;  %v968_v26 = vcvt.s32.f32 %v966_v24 }
 0x704   : > { %v980_v9 = vsel %vm851_vm9, %v962_v34, 2147483647  ;;  %v995_v10 = vsel %vm851_vm9, %v963_v62, 2147483647  ;;  %vm1050_vm14 = vcmask 23568  }
 0x705   : > { %v956_v12 = vpop.xlane.xlu1 %955  ;;  %970 = vmin.xlane.f32.xlu0 %v969_v3  ;;  %v982_v14 = vshra.s32 %v980_v9, 16  ;;  %v997_v17 = vshra.s32 %v995_v10, 16  ;;  %v981_v63 = vand.u32 65535, %v980_v9  ;;  %v996_v27 = vand.u32 65535, %v995_v10 }
 0x706   : > { %vm960_vm4 = vcmp.eq.f32.partialorder %v2386_v55, %v956_v12  ;;  %1037 = vst.msk [vmem:[#allocation2 + $0x18] sm:$0xff] %vm1033_vm12, %v956_v12 }
 0x707   : > { %v964_v19 = vsel %vm960_vm4, %v2280_v11, 6  ;;  %v984_v13 = vcvt.s32.f32 %v982_v14  ;;  %v999_v20 = vcvt.s32.f32 %v997_v17  ;;  %v983_v16 = vcvt.s32.f32 %v981_v63 }
 0x708   : > { %v1010_v21 = vsel %vm851_vm9, %v964_v19, 2147483647  ;;  %v998_v32 = vcvt.s32.f32 %v996_v27 }
 0x709   : > { %985 = vmin.xlane.f32.xlu1 %v984_v13  ;;  %1000 = vmin.xlane.f32.xlu0 %v999_v20  ;;  %v1012_v22 = vshra.s32 %v1010_v21, 16  ;;  %v1011_v33 = vand.u32 65535, %v1010_v21 }
 0x70b   : > { %v1014_v23 = vcvt.s32.f32 %v1012_v22  ;;  %v1013_v39 = vcvt.s32.f32 %v1011_v33 }
 0x70d   : > { %1015 = vmin.xlane.f32.xlu1 %v1014_v23 }
 0x792   : > { %v971_v25 = vpop.xlane.xlu0 %970 }
 0x793   : > { %vm972_vm5 = vcmp.eq.f32.partialorder %v969_v3, %v971_v25  ;;  %v977_v42 = vcvt.f32.s32 %v971_v25 }
 0x794   : > { %v973_v28 = vsel %vm972_vm5, %v968_v26, inf }
 0x795   : > { %974 = vmin.xlane.f32.xlu0 %v973_v28  ;;  %v978_v48 = vshll.u32 %v977_v42, 16 }
 0x796   : > { %v986_v29 = vpop.xlane.xlu1 %985  ;;  %v1001_v30 = vpop.xlane.xlu0 %1000 }
 0x797   : > { %vm987_vm6 = vcmp.eq.f32.partialorder %v984_v13, %v986_v29  ;;  %vm1002_vm7 = vcmp.eq.f32.partialorder %v999_v20, %v1001_v30  ;;  %v992_v45 = vcvt.f32.s32 %v986_v29  ;;  %v1007_v46 = vcvt.f32.s32 %v1001_v30 }
 0x798   : > { %v988_v35 = vsel %vm987_vm6, %v983_v16, inf  ;;  %v1003_v36 = vsel %vm1002_vm7, %v998_v32, inf }
 0x799   : > { %989 = vmin.xlane.f32.xlu1 %v988_v35  ;;  %1004 = vmin.xlane.f32.xlu0 %v1003_v36  ;;  %v993_v53 = vshll.u32 %v992_v45, 16  ;;  %v1008_v54 = vshll.u32 %v1007_v46, 16 }
 0x79a   : > { %v1016_v37 = vpop.xlane.xlu1 %1015 }
 0x79b   : > { %vm1017_vm8 = vcmp.eq.f32.partialorder %v1014_v23, %v1016_v37  ;;  %v1022_v56 = vcvt.f32.s32 %v1016_v37 }
 0x79c   : > { %v1018_v40 = vsel %vm1017_vm8, %v1013_v39, inf }
 0x79d   : > { %1019 = vmin.xlane.f32.xlu1 %v1018_v40  ;;  %v1023_v9 = vshll.u32 %v1022_v56, 16 }
 0x822   : > { %v975_v47 = vpop.xlane.xlu0 %974 }
 0x823   : > { %v976_v49 = vcvt.f32.s32 %v975_v47 }
 0x825   : > { %v979_v15 = vadd.s32 %v978_v48, %v976_v49 }
 0x826   : > { %v990_v31 = vpop.xlane.xlu1 %989  ;;  %v1005_v18 = vpop.xlane.xlu0 %1004 }
 0x827   : > { %v991_v57 = vcvt.f32.s32 %v990_v31  ;;  %v1006_v58 = vcvt.f32.s32 %v1005_v18  ;;  %vm1025_vm10 = vcmp.eq.s32.totalorder %v2280_v11, %v979_v15 }
 0x828   : > { %v1029_v59 = vsel %vm1025_vm10, inf, %v2368_v41 }
 0x829   : > { %v994_v60 = vadd.s32 %v993_v53, %v991_v57  ;;  %v1009_v34 = vadd.s32 %v1008_v54, %v1006_v58  ;;  %v1038_v62 = vsel %vm851_vm9, %v1029_v59, inf }
 0x82a   : > { %v1020_v3 = vpop.xlane.xlu1 %1019  ;;  %1039 = vmin.xlane.f32.xlu0 %v1038_v62 }
 0x82b   : > { %v1021_v10 = vcvt.f32.s32 %v1020_v3  ;;  %vm1026_vm11 = vcmp.eq.s32.totalorder %v2280_v11, %v994_v60  ;;  %vm1027_vm12 = vcmp.eq.s32.totalorder %v2280_v11, %v1009_v34 }
 0x82c   : > { %v1030_v12 = vsel %vm1026_vm11, inf, %v2375_v50  ;;  %v1031_v14 = vsel %vm1027_vm12, inf, %v2378_v52 }
 0x82d   : > { %v1024_v17 = vadd.s32 %v1023_v9, %v1021_v10  ;;  %v1041_v19 = vsel %vm851_vm9, %v1030_v12, inf  ;;  %v1044_v41 = vsel %vm851_vm9, %v1031_v14, inf }
 0x82e   : > { %1042 = vmin.xlane.f32.xlu1 %v1041_v19  ;;  %1045 = vmin.xlane.f32.xlu0 %v1044_v41 }
 0x82f   : > { %vm1028_vm13 = vcmp.eq.s32.totalorder %v2280_v11, %v1024_v17 }
 0x830   : > { %v1032_v13 = vsel %vm1028_vm13, inf, %v2386_v55 }
 0x831   : > { %v1047_v20 = vsel %vm851_vm9, %v1032_v13, inf }
 0x832   : > { %1048 = vmin.xlane.f32.xlu1 %v1047_v20 }
 0x8b7   : > { %v1040_v21 = vpop.xlane.xlu0 %1039 }
 0x8b8   : > { %1051 = vst.msk [vmem:[#allocation2] sm:$0xff] %vm1050_vm14, %v1040_v21 }
 0x8bb   : > { %v1043_v50 = vpop.xlane.xlu1 %1042  ;;  %v1046_v22 = vpop.xlane.xlu0 %1045 }
 0x8bc   : > { %1052 = vst.msk [vmem:[#allocation2 + $0x8] sm:$0xff] %vm1050_vm14, %v1043_v50  ;;  %1053 = vst.msk [vmem:[#allocation2 + $0x10] sm:$0xff] %vm1050_vm14, %v1046_v22 }
 0x8bf   : > { %v1049_v52 = vpop.xlane.xlu1 %1048 }
 0x8c0   : > { %1054 = vst.msk [vmem:[#allocation2 + $0x18] sm:$0xff] %vm1050_vm14, %v1049_v52 }
 0x8c1 PF: > { %p1055_p6 = scmp.eq.s32.totalorder %s2090_s17, 1  ;;  %p1733_p7 = scmp.ne.s32.totalorder %s2090_s17, 1 }
 0x8c2   : > { %v1059_v11 = vld [vmem:[#allocation2] sm:$0xff] (!%p1733_p7)  ;;  %vm1063_vm15 = vcmask (!%p1733_p7), 23552   ;;  %v1101_v27 = vld [vmem:[%s2615_s0 + $0x8] sm:$0xff] (!%p1733_p7)  ;;  %v1102_v29 = vld [vmem:[%s2615_s0 + $0x10] sm:$0xff] (!%p1733_p7)  ;;  %v1084_v58 = vmax.f32 (!%p1733_p7), %v2226_v44, 1e-16 }
 0x8c3   : > { %1058 = sbr.rel (%p1733_p7) target bundleno = 2609 (0xa31), region = 76  ;;  %v1060_v55 = vld [vmem:[#allocation2 + $0x8] sm:$0xff] (!%p1733_p7)  ;;  %v1061_v23 = vld [vmem:[#allocation2 + $0x10] sm:$0xff] (!%p1733_p7)  ;;  %v1064_v24 = vsel (!%p1733_p7), %vm1063_vm15, %v1059_v11, -inf  ;;  %v1100_v63 = vld [vmem:[%s2615_s0] sm:$0xff] (!%p1733_p7) }
 0x8c4   : > { %v1067_v25 = vsel (!%p1733_p7), %vm1063_vm15, %v1060_v55, -inf  ;;  %1065 = vmax.xlane.f32.xlu0 (!%p1733_p7), %v1064_v24  ;;  %v1898_v28 = vpack.c.bf16 (!%p1733_p7), %v1101_v27, %v1100_v63  ;;  %v1103_v30 = vld [vmem:[%s2615_s0 + $0x18] sm:$0xff] (!%p1733_p7)  ;;  %v1070_v16 = vsel (!%p1733_p7), %vm1063_vm15, %v1061_v23, -inf  ;;  %v1104_v35 = vld [vmem:[%s2615_s0 + $0x20] sm:$0xff] (!%p1733_p7)  ;;  %v1105_v36 = vld [vmem:[%s2615_s0 + $0x28] sm:$0xff] (!%p1733_p7)  ;;  %2028 = vrcp.f32 (!%p1733_p7), %v1084_v58 }
 0x8c5   : > { %1068 = vmax.xlane.f32.xlu1 (!%p1733_p7), %v1067_v25  ;;  %v1902_v33 = vpack.c.bf16 (!%p1733_p7), %v1103_v30, %v1102_v29  ;;  %v1906_v37 = vpack.c.bf16 (!%p1733_p7), %v1105_v36, %v1104_v35  ;;  %v1106_v39 = vld [vmem:[%s2615_s0 + $0x30] sm:$0xff] (!%p1733_p7)  ;;  %v1107_v40 = vld [vmem:[%s2615_s0 + $0x38] sm:$0xff] (!%p1733_p7)  ;;  %v1108_v45 = vld [vmem:[%s2615_s0 + $0x40] sm:$0xff] (!%p1733_p7)  ;;  %v1085_v59 = vmax.f32 (!%p1733_p7), %v2242_v2, 1e-16 }
 0x8c6   : > { %1899 = vmatprep.subr.bf16.mxu0 (!%p1733_p7), %v1898_v28  ;;  %1962 = vmatprep.subr.bf16.mxu1 (!%p1733_p7), %v1898_v28  ;;  %v1910_v42 = vpack.c.bf16 (!%p1733_p7), %v1107_v40, %v1106_v39  ;;  %v1109_v46 = vld [vmem:[%s2615_s0 + $0x48] sm:$0xff] (!%p1733_p7)  ;;  %v1110_v48 = vld [vmem:[%s2615_s0 + $0x50] sm:$0xff] (!%p1733_p7)  ;;  %v1111_v49 = vld [vmem:[%s2615_s0 + $0x58] sm:$0xff] (!%p1733_p7)  ;;  %v1086_v60 = vmax.f32 (!%p1733_p7), %v2260_v6, 1e-16 }
 0x8c7   : > { %v1062_v26 = vld [vmem:[#allocation2 + $0x18] sm:$0xff] (!%p1733_p7)  ;;  %1901 = vmatpush3.bf16.msra.mxu0 (!%p1733_p7), %v1898_v28  ;;  %1970 = vmatpush3.bf16.msra.mxu1 (!%p1733_p7), %v1898_v28  ;;  %v1914_v47 = vpack.c.bf16 (!%p1733_p7), %v1109_v46, %v1108_v45  ;;  %v1918_v15 = vpack.c.bf16 (!%p1733_p7), %v1111_v49, %v1110_v48  ;;  %v1112_v53 = vld [vmem:[%s2615_s0 + $0x60] sm:$0xff] (!%p1733_p7)  ;;  %v1113_v54 = vld [vmem:[%s2615_s0 + $0x68] sm:$0xff] (!%p1733_p7)  ;;  %v1087_v34 = vmax.f32 (!%p1733_p7), %v2238_v0, 1e-16  ;;  %2030 = vrcp.f32 (!%p1733_p7), %v1085_v59 }
 0x8c8   : > { %v1073_v32 = vsel (!%p1733_p7), %vm1063_vm15, %v1062_v26, -inf  ;;  %1071 = vmax.xlane.f32.xlu0 (!%p1733_p7), %v1070_v16  ;;  %1903 = vmatprep.subr.bf16.mxu0 (!%p1733_p7), %v1902_v33  ;;  %v1922_v31 = vpack.c.bf16 (!%p1733_p7), %v1113_v54, %v1112_v53  ;;  %v1114_v18 = vld [vmem:[%s2615_s0 + $0x70] sm:$0xff] (!%p1733_p7)  ;;  %v1115_v56 = vld [vmem:[%s2615_s0 + $0x78] sm:$0xff] (!%p1733_p7)  ;;  %2032 = vrcp.f32 (!%p1733_p7), %v1086_v60  ;;  %v1097_v43 = vld [vmem:[#allocation3 + $0x8] sm:$0xff] (!%p1733_p7) }
 0x8c9   : > { %1074 = vmax.xlane.f32.xlu1 (!%p1733_p7), %v1073_v32  ;;  %1963 = vmatprep.subr.bf16.mxu1 (!%p1733_p7), %v1902_v33  ;;  %v1926_v57 = vpack.c.bf16 (!%p1733_p7), %v1115_v56, %v1114_v18  ;;  %2034 = vrcp.f32 (!%p1733_p7), %v1087_v34  ;;  %v1099_v14 = vld [vmem:[#allocation3 + $0x18] sm:$0xff] (!%p1733_p7)  ;;  %v1098_v17 = vld [vmem:[#allocation3 + $0x10] sm:$0xff] (!%p1733_p7) }
 0x8cb   : > { %1905 = vmatpush3.bf16.msra.mxu0 %v1902_v33  ;;  %1971 = vmatpush3.bf16.msra.mxu1 %v1902_v33 }
 0x8cc   : > { %1907 = vmatprep.subr.bf16.mxu0 %v1906_v37  ;;  %1964 = vmatprep.subr.bf16.mxu1 %v1906_v37 }
 0x8ce   : > { %v2029_v9 = vpop.eup %2028 }
 0x8cf   : > { %1909 = vmatpush3.bf16.msra.mxu0 %v1906_v37  ;;  %1972 = vmatpush3.bf16.msra.mxu1 %v1906_v37 }
 0x8d0   : > { %1911 = vmatprep.subr.bf16.mxu0 %v1910_v42  ;;  %1965 = vmatprep.subr.bf16.mxu1 %v1910_v42 }
 0x8d1   : > { %v2031_v10 = vpop.eup %2030 }
 0x8d2   : > { %v2033_v44 = vpop.eup %2032 }
 0x8d3   : > { %1913 = vmatpush3.bf16.msra.mxu0 %v1910_v42  ;;  %1973 = vmatpush3.bf16.msra.mxu1 %v1910_v42  ;;  %v2035_v6 = vpop.eup %2034 }
 0x8d4   : > { %1915 = vmatprep.subr.bf16.mxu0 %v1914_v47  ;;  %1966 = vmatprep.subr.bf16.mxu1 %v1914_v47 }
 0x8d7   : > { %1917 = vmatpush3.bf16.msra.mxu0 %v1914_v47  ;;  %1974 = vmatpush3.bf16.msra.mxu1 %v1914_v47 }
 0x8d8   : > { %1919 = vmatprep.subr.bf16.mxu0 %v1918_v15  ;;  %1967 = vmatprep.subr.bf16.mxu1 %v1918_v15 }
 0x8db   : > { %1921 = vmatpush3.bf16.msra.mxu0 %v1918_v15  ;;  %1975 = vmatpush3.bf16.msra.mxu1 %v1918_v15 }
 0x8dc   : > { %1923 = vmatprep.subr.bf16.mxu0 %v1922_v31  ;;  %1968 = vmatprep.subr.bf16.mxu1 %v1922_v31 }
 0x8df   : > { %1925 = vmatpush3.bf16.msra.mxu0 %v1922_v31  ;;  %1976 = vmatpush3.bf16.msra.mxu1 %v1922_v31 }
 0x8e0   : > { %1927 = vmatprep.subr.bf16.mxu0 %v1926_v57  ;;  %1969 = vmatprep.subr.bf16.mxu1 %v1926_v57 }
 0x8e3   : > { %1929 = vmatpush3.bf16.msra.mxu0 %v1926_v57  ;;  %1977 = vmatpush3.bf16.msra.mxu1 %v1926_v57 }
 0x951   : > { %v1066_v62 = vpop.xlane.xlu0 %1065 }
 0x952   : > { %v1069_v3 = vpop.xlane.xlu1 %1068  ;;  %vm1076_vm9 = vcmp.le.f32.partialorder %v2234_v51, %v1066_v62  ;;  %v1096_v51 = vld [vmem:[#allocation3] sm:$0xff] }
 0x953   : > { %vm1077_vm4 = vcmp.le.f32.partialorder %v2258_v5, %v1069_v3  ;;  %vm1080_vm6 = vmand %vm630_vm0, %vm1076_vm9  ;;  %vm1205_vm0 = vcmask 39936  }
 0x954   : > { %vm1081_vm5 = vmand %vm631_vm2, %vm1077_vm4  ;;  %1838 = vmatprep.mubr.msk.f32.mxu0 %vm1080_vm6, %v2029_v9 }
 0x955   : > { %v1072_v0 = vpop.xlane.xlu0 %1071  ;;  %1839 = vmatmul.mubr.msk.f32.vlgmr.msra.gmra.mrb[0].mxu0 %vm1081_vm5, %v2031_v10 }
 0x956   : > { %v1075_v2 = vpop.xlane.xlu1 %1074  ;;  %vm1078_vm7 = vcmp.le.f32.partialorder %v2270_v8, %v1072_v0 }
 0x957   : > { %vm1079_vm8 = vcmp.le.f32.partialorder %v2252_v4, %v1075_v2  ;;  %vm1082_vm10 = vmand %vm632_vm3, %vm1078_vm7 }
 0x958   : > { %vm1083_vm2 = vmand %vm633_vm1, %vm1079_vm8  ;;  %1841 = vmatprep.mubr.msk.f32.mxu1 %vm1082_vm10, %v2033_v44 }
 0x959   : > { %1842 = vmatmul.mubr.msk.f32.vlgmr.msra.gmra.mrb[0].mxu1 %vm1083_vm2, %v2035_v6 }
 0xa28   : > { %v1840_v1 = vpop.f32.mrb[0].mxu0 }
 0xa29   : > { %v1202_v5 = vadd.f32 %v1840_v1, %v1097_v43  ;;  %v1182_v12 = vpop.f32.mrb[1].mxu0 }
 0xa2a   : > { %v1201_v8 = vadd.f32 %v1182_v12, %v1096_v51 }
 0xa2b   : > { %1207 = vst.msk [vmem:[#allocation3 + $0x8] sm:$0xff] %vm1205_vm0, %v1202_v5 }
 0xa2c   : > { %v1843_v4 = vpop.f32.mrb[0].mxu1  ;;  %1206 = vst.msk [vmem:[#allocation3] sm:$0xff] %vm1205_vm0, %v1201_v8 }
 0xa2d   : > { %v1204_v7 = vadd.f32 %v1843_v4, %v1099_v14  ;;  %v1192_v19 = vpop.f32.mrb[1].mxu1 }
 0xa2e   : > { %v1203_v41 = vadd.f32 %v1192_v19, %v1098_v17 }
 0xa2f   : > { %1209 = vst.msk [vmem:[#allocation3 + $0x18] sm:$0xff] %vm1205_vm0, %v1204_v7 }
 0xa30   : > { %1208 = vst.msk [vmem:[#allocation3 + $0x10] sm:$0xff] %vm1205_vm0, %v1203_v41 }
 0xa31 PF: > { %1213 = sbr.rel (!%p1055_p6) target bundleno = 3198 (0xc7e), region = 80  ;;  %v2105_v20 = vmov (%p1055_p6), 4   ;;  %v1255_v55 = vld [vmem:[%s2622_s7] sm:$0xff] (%p1055_p6)  ;;  %vm1256_vm1 = vcmask (%p1055_p6), 64512   ;;  %v1252_v24 = vld [vmem:[%s2620_s5 + $0x8] sm:$0xff] (%p1055_p6)  ;;  %v1253_v25 = vld [vmem:[%s2620_s5 + $0x10] sm:$0xff] (%p1055_p6) }
 0xa32   : > { %2037 = vset.pattern.permute.xlu1 (%p1055_p6), %v2105_v20  ;;  %2036 = vset.pattern.permute.xlu0 (%p1055_p6), %v2105_v20  ;;  %v2498_v22 = vld [vmem:[#allocation3 + $0x8] sm:$0xff] (%p1055_p6)  ;;  %v1251_v23 = vld [vmem:[%s2620_s5] sm:$0xff] (%p1055_p6)  ;;  %v1254_v26 = vld [vmem:[%s2620_s5 + $0x18] sm:$0xff] (%p1055_p6)  ;;  %vm1367_vm3 = vcmask (%p1055_p6), 1044480   ;;  %vm1354_vm11 = vcmask (%p1055_p6), 39936  }
 0xa33   : > { %v2492_v61 = vld [vmem:[#allocation3] sm:$0xff] (%p1055_p6)  ;;  %v1219_v11 = vmax.f32 (%p1055_p6), %v2498_v22, 1e-30  ;;  %1844 = vmatprep.subr.mxu0 (%p1055_p6), %v1255_v55  ;;  %1846 = vmatprep.mubr.msk.f32.mxu0 (%p1055_p6), %vm1256_vm1, %v1251_v23  ;;  %v1472_v28 = vld [vmem:[%s2624_s9 + $0x8] sm:$0xff] (%p1055_p6)  ;;  %v1473_v29 = vld [vmem:[%s2624_s9 + $0x10] sm:$0xff] (%p1055_p6) }
 0xa34   : > { %v1218_v50 = vmax.f32 (%p1055_p6), %v2492_v61, 1e-30  ;;  %1845 = vmatpush3.msra.mxu0 (%p1055_p6), %v1255_v55  ;;  %v1250_v63 = vld [vmem:[%s2621_s6] sm:$0x1f] (%p1055_p6)  ;;  %v1474_v16 = vld [vmem:[%s2624_s9 + $0x18] sm:$0xff] (%p1055_p6)  ;;  %v1476_v35 = vld [vmem:[%s2624_s9 + $0x28] sm:$0xff] (%p1055_p6) }
 0xa35   : > { %1847 = vmatmul.mubr.msk.f32.vlgmr.msra.gmra.mrb[0].mxu0 (%p1055_p6), %vm1256_vm1, %v1252_v24  ;;  %1852 = vmatprep.subr.msk.mxu0 (%p1055_p6), %vm1367_vm3, %v1250_v63  ;;  %v1471_v27 = vld [vmem:[%s2624_s9] sm:$0xff] (%p1055_p6)  ;;  %v1934_v32 = vpack.c.bf16 (%p1055_p6), %v1474_v16, %v1473_v29  ;;  %v1477_v37 = vld [vmem:[%s2624_s9 + $0x30] sm:$0xff] (%p1055_p6)  ;;  %v1478_v39 = vld [vmem:[%s2624_s9 + $0x38] sm:$0xff] (%p1055_p6) }
 0xa36   : > { %v2494_v13 = vld [vmem:[#allocation3 + $0x18] sm:$0xff] (%p1055_p6)  ;;  %1224 = vperm.xlu0 (%p1055_p6), %2036, %v1218_v50   ;;  %1849 = vmatprep.mubr.msk.f32.mxu0 (%p1055_p6), %vm1256_vm1, %v1253_v25  ;;  %v1930_v30 = vpack.c.bf16 (%p1055_p6), %v1472_v28, %v1471_v27  ;;  %v1475_v33 = vld [vmem:[%s2624_s9 + $0x20] sm:$0xff] (%p1055_p6)  ;;  %v1942_v40 = vpack.c.bf16 (%p1055_p6), %v1478_v39, %v1477_v37  ;;  %v1480_v45 = vld [vmem:[%s2624_s9 + $0x48] sm:$0xff] (%p1055_p6) }
 0xa37   : > { %v2490_v38 = vld [vmem:[#allocation3 + $0x10] sm:$0xff] (%p1055_p6)  ;;  %v1221_v52 = vmax.f32 (%p1055_p6), %v2494_v13, 1e-30  ;;  %1853 = vmatpush3.msk.msra.mxu0 (%p1055_p6), %vm1367_vm3, %v1250_v63  ;;  %v1938_v36 = vpack.c.bf16 (%p1055_p6), %v1476_v35, %v1475_v33  ;;  %v1479_v42 = vld [vmem:[%s2624_s9 + $0x40] sm:$0xff] (%p1055_p6)  ;;  %v1482_v48 = vld [vmem:[%s2624_s9 + $0x58] sm:$0xff] (%p1055_p6) }
 0xa38   : > { %v1220_v21 = vmax.f32 %v2490_v38, 1e-30  ;;  %1931 = vmatprep.subr.bf16.mxu1 %v1930_v30  ;;  %v1946_v46 = vpack.c.bf16 %v1480_v45, %v1479_v42  ;;  %v1481_v47 = vld [vmem:[%s2624_s9 + $0x50] sm:$0xff]  ;;  %v1483_v15 = vld [vmem:[%s2624_s9 + $0x60] sm:$0xff]  ;;  %v1484_v53 = vld [vmem:[%s2624_s9 + $0x68] sm:$0xff] }
 0xa39   : > { %1850 = vmatmul.mubr.msk.f32.gmra.mrb[2].mxu0 %vm1256_vm1, %v1254_v26  ;;  %1933 = vmatpush3.bf16.msra.mxu1 %v1930_v30  ;;  %v1950_v49 = vpack.c.bf16 %v1482_v48, %v1481_v47  ;;  %v1954_v54 = vpack.c.bf16 %v1484_v53, %v1483_v15  ;;  %v1485_v44 = vld [vmem:[%s2624_s9 + $0x70] sm:$0xff]  ;;  %v1486_v0 = vld [vmem:[%s2624_s9 + $0x78] sm:$0xff]  ;;  %v1748_v6 = vld [vmem:[%s2623_s8] ss:$0 sm:$0xff] }
 0xa3a   : > { %1234 = vperm.xlu1 %2037, %v1220_v21   ;;  %1229 = vperm.xlu0 %2036, %v1219_v11   ;;  %v1958_v2 = vpack.c.bf16 %v1486_v0, %v1485_v44 }
 0xa3b   : > { %1935 = vmatprep.subr.bf16.mxu1 %v1934_v32 }
 0xa3d   : > { %1937 = vmatpush3.bf16.msra.mxu1 %v1934_v32 }
 0xa3e   : > { %1239 = vperm.xlu1 %2037, %v1221_v52   ;;  %1939 = vmatprep.subr.bf16.mxu1 %v1938_v36 }
 0xa41   : > { %1941 = vmatpush3.bf16.msra.mxu1 %v1938_v36 }
 0xa42   : > { %1943 = vmatprep.subr.bf16.mxu1 %v1942_v40 }
 0xa45   : > { %1945 = vmatpush3.bf16.msra.mxu1 %v1942_v40 }
 0xa46   : > { %1947 = vmatprep.subr.bf16.mxu1 %v1946_v46 }
 0xa49   : > { %1949 = vmatpush3.bf16.msra.mxu1 %v1946_v46 }
 0xa4a   : > { %1951 = vmatprep.subr.bf16.mxu1 %v1950_v49 }
 0xa4d   : > { %1953 = vmatpush3.bf16.msra.mxu1 %v1950_v49 }
 0xa4e   : > { %1955 = vmatprep.subr.bf16.mxu1 %v1954_v54 }
 0xa51   : > { %1957 = vmatpush3.bf16.msra.mxu1 %v1954_v54 }
 0xa52   : > { %1959 = vmatprep.subr.bf16.mxu1 %v1958_v2 }
 0xa55   : > { %1961 = vmatpush3.bf16.msra.mxu1 %v1958_v2 }
 0xab5   : > { %v1225_v18 = vpop.permute.xlu0 %1224 }
 0xab6   : > { %2038 = vrcp.f32 %v1225_v18 }
 0xab9   : > { %v1235_v31 = vpop.permute.xlu1 %1234  ;;  %v1230_v56 = vpop.permute.xlu0 %1229 }
 0xaba   : > { %2040 = vrcp.f32 %v1235_v31 }
 0xabb   : > { %2042 = vrcp.f32 %v1230_v56 }
 0xabd   : > { %v1240_v57 = vpop.permute.xlu1 %1239 }
 0xabe   : > { %2044 = vrcp.f32 %v1240_v57 }
 0xac0   : > { %v2039_v58 = vpop.eup %2038 }
 0xac1   : > { %v1243_v60 = vmul.f32 %v2039_v58, %v2492_v61 }
 0xac3   : > { %1854 = vmatprep.mubr.msk.f32.mxu0 %vm1354_vm11, %v1243_v60 }
 0xac4   : > { %v2041_v59 = vpop.eup %2040 }
 0xac5   : > { %v2043_v34 = vpop.eup %2042  ;;  %v1247_v62 = vmul.f32 %v2041_v59, %v2490_v38  ;;  %v1749_v38 = vld [vmem:[%s2625_s10] ss:$0 sm:$0xff] }
 0xac6   : > { %v1245_v3 = vmul.f32 %v2043_v34, %v2498_v22 }
 0xac8   : > { %v2045_v9 = vpop.eup %2044  ;;  %1855 = vmatmul.mubr.msk.f32.vlgmr.msra.gmra.mrb[0].mxu0 %vm1354_vm11, %v1245_v3 }
 0xac9   : > { %1857 = vmatprep.mubr.msk.f32.mxu0 %vm1354_vm11, %v1247_v62  ;;  %v1249_v10 = vmul.f32 %v2045_v9, %v2494_v13 }
 0xacc   : > { %1858 = vmatmul.mubr.msk.f32.gmra.mrb[2].mxu0 %vm1354_vm11, %v1249_v10 }
 0xb9b   : > { %v1856_v43 = vpop.f32.mrb[0].mxu0 }
 0xb9c   : > { %v1464_v51 = vadd.f32 %v1856_v43, %v1748_v6  ;;  %v1437_v1 = vpop.f32.mrb[1].mxu0 }
 0xb9d   : > { %v1463_v5 = vadd.f32 %v1748_v6, %v1437_v1 }
 0xb9e   : > { %v1468_v8 = vmax.f32 %v1464_v51, 0.0 }
 0xb9f   : > { %v1859_v12 = vpop.f32.mrb[2].mxu0  ;;  %v1467_v14 = vmax.f32 %v1463_v5, 0.0 }
 0xba0   : > { %v1466_v17 = vadd.f32 %v1859_v12, %v1748_v6  ;;  %v1447_v4 = vpop.f32.mrb[3].mxu0 }
 0xba1   : > { %v1465_v7 = vadd.f32 %v1748_v6, %v1447_v4  ;;  %1892 = vmatprep.mubr.f32.mxu1 %v1467_v14 }
 0xba2   : > { %1893 = vmatmul.mubr.f32.vlgmr.msra.gmra.mrb[0].mxu1 %v1468_v8  ;;  %v1470_v41 = vmax.f32 %v1466_v17, 0.0 }
 0xba3   : > { %v1469_v19 = vmax.f32 %v1465_v7, 0.0 }
 0xba5   : > { %1895 = vmatprep.mubr.f32.mxu1 %v1469_v19 }
 0xba6   : > { %1896 = vmatmul.mubr.f32.gmra.mrb[2].mxu1 %v1470_v41 }
 0xc75   : > { %v1894_v61 = vpop.f32.mrb[0].mxu1 }
 0xc76   : > { %v1566_v13 = vadd.f32 %v1894_v61, %v1749_v38  ;;  %v1560_v20 = vpop.f32.mrb[1].mxu1 }
 0xc77   : > { %v1561_v21 = vadd.f32 %v1749_v38, %v1560_v20 }
 0xc78   : > { %1580 = vst [vmem:[#allocation5 + $0x8] sm:$0xff] %v1566_v13 }
 0xc79   : > { %1579 = vst [vmem:[#allocation5] sm:$0xff] %v1561_v21  ;;  %v1897_v50 = vpop.f32.mrb[2].mxu1 }
 0xc7a   : > { %v1576_v22 = vadd.f32 %v1897_v50, %v1749_v38  ;;  %v1570_v52 = vpop.f32.mrb[3].mxu1 }
 0xc7b   : > { %v1571_v11 = vadd.f32 %v1749_v38, %v1570_v52 }
 0xc7c   : > { %1582 = vst [vmem:[#allocation5 + $0x18] sm:$0xff] %v1576_v22 }
 0xc7d   : > { %1581 = vst [vmem:[#allocation5 + $0x10] sm:$0xff] %v1571_v11 }
 0xc7e PF: > { %p2580_p8 = scmp.eq.s32.totalorder %s1720_s20, 1  ;;  %s2106_s16 = smov [#allocation5]  }
 0xc7f   : > { %s1592_s22 = sshll.u32 %s2106_s16, 4  ;;  %s1593_s22 = int_to_ptr.vmem [resolvable:$true] %s1592_s22 }
 0xc80   : > { %s2046_s23 = scalar_lea.vmem %s1593_s22, 512  ;;  %p2053_p12 = scmp.lt.s32.totalorder %s1593_s22, %s1593_s22 }
 0xc81   : > { %p2047_p9 = scmp.ne.s32.totalorder %s1593_s22, %s2046_s23  ;;  %p2054_p13 = scmp.lt.s32.totalorder %s2046_s23, %s2046_s23 }
 0xc83   : > { %p2048_p10 = pnand %p2047_p9, %p2580_p8  ;;  %p2055_p0 = por %p2054_p13, %p2053_p12 }
 0xc85   : > { %p2049_p11 = pneg %p2048_p10 }
 0xc87   : > { %p2056_p1 = pnand %p2055_p0, %p2049_p11 }
 0xc89   : > { %2059 = shalt.err (!%p2056_p1)
}
 0xc8a   : > { %s2060_s20 = scalar_lea.hbm %s2626_s11, 512 }
 0xc8b   : > { %p2061_p2 = scmp.ne.s32.totalorder %s2626_s11, %s2060_s20  ;;  %p2066_p5 = scmp.lt.u32.totalorder %s2060_s20, %s2626_s11 }
 0xc8d   : > { %p2062_p3 = pnand %p2061_p2, %p2580_p8 }
 0xc8f   : > { %p2063_p4 = pneg %p2062_p3 }
 0xc91   : > { %p2068_p6 = pnand %p2066_p5, %p2063_p4 }
 0xc93   : > { %2071 = shalt.err (!%p2068_p6)
}
 0xc94   : > { %s2107_s30 = smov 128   ;;  %s2108_s12 = smov 8  }
 0xc95   : > { %1983 = dma.vmem_to_hbm [thread:$0]  (%p2580_p8), %s1593_s22, 512, %s2626_s11, [#allocation6], %s2107_s30, %s2107_s30, %s2108_s12  }
 0xc96   : > { %2085 = dma.done.wait (%p2580_p8), [#allocation6], 512  }
 0xc97   : > { %2087 = vsyncadd (%p2580_p8), [#allocation6], 4294966784 }
 0xc98 PF: > { %s22_s19 = sadd.s32 1, %s2098_s19   ;;  %s2628_s17 = smov %s2094_s18 }
 0xc99   : > { %p19_p7 = scmp.ge.s32.totalorder %s22_s19, 4   ;;  %s2629_s18 = smov %s2631_s21 }
 0xc9b   :  { %21 = sbr.rel (!%p19_p7) target bundleno = 2 (0x2), region = 123 }
 0xca2   :  { %1608 = vsyncpa [#allocation6], 1 }
 0xca3   :  { %1610 = vsyncpa [#allocation6 + $0x1], 1 }

</bundles_post_ra>
